<compile_context>
chip_gen: v7x
topology: tpu7x:2x2x1
jax: 0.10.0
libtpu: 0.0.40
codegen_flags: <defaults>
</compile_context>

<pallas_src>
import jax
import jax.numpy as jnp
from jax.experimental import pallas as pl
from jax.experimental.pallas import tpu as pltpu

# Points per grid step.  Live per-step intermediates are ~(64, tile_n) f32 * ~8 tensors
# ≈ 16 MB at 8192, comfortably inside the 48 MiB scoped-VMEM limit below (and under the
# 64 MiB/TC physical VMEM of v7x).  Sweep 4k-8k on v5e/v7x, 8k-16k on v6e.
MAX_TILE_N = 8192
VMEM_LIMIT_BYTES = 48 * 1024 * 1024   # > v5e's 16 MiB scoped default, < v7x's 64 MiB/TC


def _round_up(v, m):
    return ((v + m - 1) // m) * m


def _tiling(n):
    """Lane-dense point-tile size (multiple of 128) and padded point count."""
    tile = min(MAX_TILE_N, _round_up(n, 128))
    return tile, _round_up(n, tile)


# ---------------------------------------------------------------------------
# in-kernel helpers (transposed layout: activations are (C, points))
# ---------------------------------------------------------------------------
def _outer_fma(x, wt):
    """y = wt @ x as K unrolled broadcast-FMAs on the VPU (outer-product accumulation).

    Used when the contraction K<=8 (conv1, xyz rows of head1) or the output channel
    count <=8 (head3): such matmuls would fill only a sliver of the MXU and still pay
    the full systolic push/drain latency.
    """
    k_dim = wt.shape[1]
    acc = wt[:, 0:1] * x[0:1, :]
    for k in range(1, k_dim):
        acc = acc + wt[:, k : k + 1] * x[k : k + 1, :]
    return acc


def _dense_t(x, wt_ref, b_ref=None, relu=False):
    """Shared 1x1-conv layer in transposed layout: (Cin, pts) -> (Cout, pts), f32 result.

    Wide contractions use bf16 MXU inputs (weights are pre-cast bf16 residents) with f32
    accumulation; the big "pts" dim sits on the MXU/vreg lane axis so output stores are
    lane-dense.  Bias/ReLU epilogue stays in f32 (v5e has no bf16 VPU).
    """
    wt = wt_ref[...]                       # (Cout, Cin), bf16 resident
    cout, k = wt.shape
    if k <= 8 or cout <= 8:
        y = _outer_fma(x, wt)              # VPU path (tiny K or tiny Cout)
    else:
        y = jnp.dot(wt, x.astype(jnp.bfloat16),
                    preferred_element_type=jnp.float32)
    if b_ref is not None:
        y = y + b_ref[...]                 # (Cout, 1) f32 broadcast along lanes
    if relu:
        y = jnp.maximum(y, 0.0)
    return y


def _resident(arr):
    """Full-array block + constant index map: DMA'd to VMEM once, resident across the
    whole grid (weights / biases)."""
    nd = arr.ndim
    return pl.BlockSpec(arr.shape, lambda *_: (0,) * nd)


# ---------------------------------------------------------------------------
# Pallas kernels
# ---------------------------------------------------------------------------
def _enc_feat_kernel(x_ref, c1w, c1b, c2w, c2b, c3w, c3b, g_ref):
    """Encoder pass 1: conv1->conv2->conv3 fused with a streaming global max-pool.

    Grid = (batch, tile); g_ref (64, 1) is the per-batch resident output block (constant
    index map over the tile axis) and doubles as the running-max accumulator.
    """
    @pl.when(pl.program_id(1) == 0)
    def _init():
        g_ref[...] = jnp.full(g_ref.shape, -jnp.inf, dtype=g_ref.dtype)

    h = _dense_t(x_ref[...], c1w, c1b, relu=True)     # (32, T)
    h = _dense_t(h, c2w, c2b, relu=True)              # (64, T)
    h = _dense_t(h, c3w, c3b)                         # (64, T)
    g_ref[...] = jnp.maximum(g_ref[...], jnp.max(h, axis=1, keepdims=True))


def _enc_head_dec_kernel(x_ref, gterm_ref,
                         c1w, c1b, c2w, c2b,
                         w1x, w1p, h2w, h2b, h3w, h3b,
                         d1w, d1b, d2w, d2b, d3w, d3b,
                         enc_ref, dmax_ref):
    """Encoder pass 2 (per-point head MLP + residual) fused with the decoder conv chain.

    head1([xyz | pointfeat | globalfeat | msg]) is evaluated as W1xᵀ@xyz + W1pᵀ@pf +
    gterm (gterm = tile-invariant globalfeat/msg/bias term, precomputed in the wrapper),
    so the concat never exists.  pointfeat is recomputed from xyz (two small matmuls)
    instead of round-tripping a (B, 64, N) activation through HBM.  The decoder shared
    MLP consumes the encoded tile directly from VMEM (noise_layer = Identity) and
    max-accumulates into the resident dmax output block.
    """
    @pl.when(pl.program_id(1) == 0)
    def _init():
        dmax_ref[...] = jnp.full(dmax_ref.shape, -jnp.inf, dtype=dmax_ref.dtype)

    xyz = x_ref[...]                                  # (3, T)

    # recompute per-point local features
    h = _dense_t(xyz, c1w, c1b, relu=True)            # (32, T)
    pf = _dense_t(h, c2w, c2b, relu=True)             # (64, T)

    # head MLP + residual offset
    h = _dense_t(xyz, w1x) + _dense_t(pf, w1p) + gterm_ref[...]
    h = jnp.maximum(h, 0.0)                           # (64, T)
    h = _dense_t(h, h2w, h2b, relu=True)              # (32, T)
    off = _dense_t(h, h3w, h3b)                       # (3, T)  VPU (Cout=3)
    enc = xyz + off
    enc_ref[...] = enc                                # lane-dense store

    # decoder shared MLP + streaming max-pool on the in-VMEM encoded tile
    h = _dense_t(enc, d1w, d1b, relu=True)            # (32, T)
    h = _dense_t(h, d2w, d2b, relu=True)              # (64, T)
    h = _dense_t(h, d3w, d3b)                         # (64, T)
    dmax_ref[...] = jnp.maximum(dmax_ref[...], jnp.max(h, axis=1, keepdims=True))


# ---------------------------------------------------------------------------
# Weight prep (transpose + bf16 pre-cast; biases as f32 columns)
# ---------------------------------------------------------------------------
def _wt(layer):
    return layer["w"].T.astype(jnp.bfloat16)          # (Cout, Cin) bf16 resident


def _bcol(layer):
    return layer["b"].reshape(-1, 1)                  # (Cout, 1) f32


# ---------------------------------------------------------------------------
# Forward pass
# ---------------------------------------------------------------------------
def pointnet_ed_forward(params, xyz, faces, msg, idx):
    # faces / idx are accepted but unused, matching the PyTorch forward.
    B, N, _ = xyz.shape
    tile_n, n_pad = _tiling(N)
    nt = n_pad // tile_n
    enc, dec = params["encoder"], params["decoder"]

    # channels-on-sublanes / points-on-lanes layout; edge-replicated padding never
    # changes the global max-pools and padded columns are sliced off below.
    xyz_t = jnp.transpose(xyz, (0, 2, 1))             # (B, 3, N)
    if n_pad != N:
        xyz_t = jnp.pad(xyz_t, ((0, 0), (0, 0), (0, n_pad - N)), mode="edge")

    x_spec = pl.BlockSpec((None, 3, tile_n), lambda b, t: (b, 0, t))
    col64_spec = pl.BlockSpec((None, 64, 1), lambda b, t: (b, 0, 0))
    cparams = pltpu.CompilerParams(
        dimension_semantics=("parallel", "arbitrary"),   # batch across TCs on v7x
        vmem_limit_bytes=VMEM_LIMIT_BYTES)

    # ---- pass 1: shared point MLP + streaming per-batch global max-pool -> (B, 64, 1)
    feat_w = (_wt(enc["conv1"]), _bcol(enc["conv1"]),
              _wt(enc["conv2"]), _bcol(enc["conv2"]),
              _wt(enc["conv3"]), _bcol(enc["conv3"]))
    gfeat = pl.pallas_call(
        _enc_feat_kernel,
        out_shape=jax.ShapeDtypeStruct((B, 64, 1), jnp.float32),
        grid_spec=pltpu.PrefetchScalarGridSpec(
            num_scalar_prefetch=0,
            grid=(B, nt),
            in_specs=[x_spec] + [_resident(a) for a in feat_w],
            out_specs=col64_spec,
        ),
        compiler_params=cparams,
    )(xyz_t, *feat_w)

    # ---- tile-invariant head1 conditioning term, hoisted to the wrapper (tiny XLA)
    w1 = enc["head1"]["w"]
    w1x, w1p, w1g, w1m = jnp.split(w1, [3, 3 + 64, 3 + 64 + 64], axis=0)
    gterm = gfeat[:, :, 0] @ w1g + msg @ w1m + enc["head1"]["b"]     # (B, 64)
    gterm_col = gterm[:, :, None].astype(jnp.float32)                # (B, 64, 1)

    # ---- pass 2 + decoder convs, fused in one pallas_call
    head_w = (_wt(enc["conv1"]), _bcol(enc["conv1"]),
              _wt(enc["conv2"]), _bcol(enc["conv2"]),
              w1x.T.astype(jnp.bfloat16), w1p.T.astype(jnp.bfloat16),
              _wt(enc["head2"]), _bcol(enc["head2"]),
              _wt(enc["head3"]), _bcol(enc["head3"]),
              _wt(dec["conv1"]), _bcol(dec["conv1"]),
              _wt(dec["conv2"]), _bcol(dec["conv2"]),
              _wt(dec["conv3"]), _bcol(dec["conv3"]))
    encoded_t, dmax = pl.pallas_call(
        _enc_head_dec_kernel,
        out_shape=(jax.ShapeDtypeStruct((B, 3, n_pad), jnp.float32),
                   jax.ShapeDtypeStruct((B, 64, 1), jnp.float32)),
        grid_spec=pltpu.PrefetchScalarGridSpec(
            num_scalar_prefetch=0,
            grid=(B, nt),
            in_specs=[x_spec, col64_spec] + [_resident(a) for a in head_w],
            out_specs=[x_spec, col64_spec],
        ),
        compiler_params=cparams,
    )(xyz_t, gterm_col, *head_w)

    encoded_xyz = jnp.transpose(encoded_t[:, :, :N], (0, 2, 1))      # (B, N, 3)

    # ---- decoder FC head on the tiny (B, 64) pooled feature (pure XLA)
    g = jnp.maximum(dmax[:, :, 0] @ dec["fc1"]["w"] + dec["fc1"]["b"], 0.0)
    decoded_msg = g @ dec["fc2"]["w"] + dec["fc2"]["b"]              # (B, ydim)
    return encoded_xyz, decoded_msg


# ---------------------------------------------------------------------------
# Parameter construction (deterministic, synthetic)
# ---------------------------------------------------------------------------
def _init_linear(key, cin, cout, scale=0.1):
    kw, kb = jax.random.split(key)
    w = scale * jax.random.normal(kw, (cin, cout), dtype=jnp.float32)
    b = scale * jax.random.normal(kb, (cout,), dtype=jnp.float32)
    return {"w": w, "b": b}


def init_params(key, ydim=8):
    keys = jax.random.split(key, 12)
    # encoder: shared point MLP 3 -> 32 -> 64 -> 64, then per-point head on
    # concat([xyz(3), pointfeat(64), globalfeat(64), msg(ydim)]) -> 64 -> 32 -> 3
    enc = {
        "conv1": _init_linear(keys[0], 3, 32),
        "conv2": _init_linear(keys[1], 32, 64),
        "conv3": _init_linear(keys[2], 64, 64),
        "head1": _init_linear(keys[3], 3 + 64 + 64 + ydim, 64),
        "head2": _init_linear(keys[4], 64, 32),
        "head3": _init_linear(keys[5], 32, 3),
    }
    # decoder: shared point MLP 3 -> 32 -> 64 -> 64, max-pool, FC 64 -> 32 -> ydim
    dec = {
        "conv1": _init_linear(keys[6], 3, 32),
        "conv2": _init_linear(keys[7], 32, 64),
        "conv3": _init_linear(keys[8], 64, 64),
        "fc1": _init_linear(keys[9], 64, 32),
        "fc2": _init_linear(keys[10], 32, ydim),
    }
    return {"encoder": enc, "decoder": dec}


# ---------------------------------------------------------------------------
# Main
# ---------------------------------------------------------------------------
if __name__ == "__main__":
    key = jax.random.PRNGKey(0)
    k_params, k_xyz, k_faces, k_msg = jax.random.split(key, 4)

    B, N, YDIM = 2, 16, 8
    params = init_params(k_params, ydim=YDIM)

    xyz = jax.random.normal(k_xyz, (B, N, 3), dtype=jnp.float32)
    faces = jax.random.randint(k_faces, (B, 24, 3), 0, N)
    msg = jax.random.bernoulli(k_msg, 0.5, (B, YDIM)).astype(jnp.float32)
    idx = jnp.arange(B, dtype=jnp.int32)

    fwd = jax.jit(pointnet_ed_forward)
    encoded_xyz, decoded_msg = fwd(params, xyz, faces, msg, idx)
    jax.block_until_ready((encoded_xyz, decoded_msg))

    assert encoded_xyz.shape == (B, N, 3)
    assert decoded_msg.shape == (B, YDIM)
    assert encoded_xyz.dtype == jnp.float32 and decoded_msg.dtype == jnp.float32
    assert bool(jnp.all(jnp.isfinite(encoded_xyz))) and bool(jnp.all(jnp.isfinite(decoded_msg)))
    print("KERNEL_OK")
</pallas_src>

<mosaic_0001>
module attributes {stable_mosaic.version = 11 : i64} {
  func.func @_enc_feat_kernel(%arg0: i32, %arg1: i32, %arg2: memref<1x3x128xf32, #tpu.memory_space<vmem>>, %arg3: memref<32x3xbf16, #tpu.memory_space<vmem>>, %arg4: memref<32x1xf32, #tpu.memory_space<vmem>>, %arg5: memref<64x32xbf16, #tpu.memory_space<vmem>>, %arg6: memref<64x1xf32, #tpu.memory_space<vmem>>, %arg7: memref<64x64xbf16, #tpu.memory_space<vmem>>, %arg8: memref<64x1xf32, #tpu.memory_space<vmem>>, %arg9: memref<1x64x1xf32, #tpu.memory_space<vmem>>) attributes {dimension_semantics = [#tpu.dimension_semantics<parallel>, #tpu.dimension_semantics<arbitrary>], iteration_bounds = array<i64: 2, 1>, scalar_prefetch = 0 : i64, scratch_operands = 0 : i64, tpu.core_type = #tpu.core_type<tc>, window_params = [{transform_indices = @transform_0, window_bounds = array<i64: 1, 3, 128>}, {pipeline_mode = #tpu.pipeline_mode<synchronous>, transform_indices = @transform_1, window_bounds = array<i64: 32, 3>}, {pipeline_mode = #tpu.pipeline_mode<synchronous>, transform_indices = @transform_2, window_bounds = array<i64: 32, 1>}, {pipeline_mode = #tpu.pipeline_mode<synchronous>, transform_indices = @transform_3, window_bounds = array<i64: 64, 32>}, {pipeline_mode = #tpu.pipeline_mode<synchronous>, transform_indices = @transform_4, window_bounds = array<i64: 64, 1>}, {pipeline_mode = #tpu.pipeline_mode<synchronous>, transform_indices = @transform_5, window_bounds = array<i64: 64, 64>}, {pipeline_mode = #tpu.pipeline_mode<synchronous>, transform_indices = @transform_6, window_bounds = array<i64: 64, 1>}, {transform_indices = @transform_7, window_bounds = array<i64: 1, 64, 1>}]} {
    %c0_i32 = arith.constant 0 : i32
    %0 = arith.cmpi eq, %arg1, %c0_i32 : i32
    %1 = arith.extui %0 : i1 to i32
    %c0_i32_0 = arith.constant 0 : i32
    %2 = arith.cmpi ne, %1, %c0_i32_0 : i32
    scf.if %2 {
      %cst_25 = arith.constant 0xFF800000 : f32
      %53 = vector.broadcast %cst_25 : f32 to vector<64x1xf32>
      %c0_26 = arith.constant 0 : index
      %c0_27 = arith.constant 0 : index
      %c0_28 = arith.constant 0 : index
      %54 = vector.load %arg9[%c0_26, %c0_27, %c0_28] : memref<1x64x1xf32, #tpu.memory_space<vmem>>, vector<1x64x1xf32>
      %55 = vector.shape_cast %54 : vector<1x64x1xf32> to vector<64x1xf32>
      %56 = vector.shape_cast %53 : vector<64x1xf32> to vector<1x64x1xf32>
      tpu.vector_store %arg9[%c0_26, %c0_27, %c0_28], %56 {strides = array<i32>} : memref<1x64x1xf32, #tpu.memory_space<vmem>>, vector<1x64x1xf32>,
    } else {
    }
    %c0 = arith.constant 0 : index
    %c0_1 = arith.constant 0 : index
    %c0_2 = arith.constant 0 : index
    %3 = vector.load %arg2[%c0, %c0_1, %c0_2] : memref<1x3x128xf32, #tpu.memory_space<vmem>>, vector<1x3x128xf32>
    %4 = vector.shape_cast %3 : vector<1x3x128xf32> to vector<3x128xf32>
    %c0_3 = arith.constant 0 : index
    %c0_4 = arith.constant 0 : index
    %5 = vector.load %arg3[%c0_3, %c0_4] : memref<32x3xbf16, #tpu.memory_space<vmem>>, vector<32x3xbf16>
    %6 = vector.extract_strided_slice %5 {offsets = [0, 0], sizes = [32, 1], strides = [1, 1]} : vector<32x3xbf16> to vector<32x1xbf16>
    %7 = vector.extract_strided_slice %4 {offsets = [0, 0], sizes = [1, 128], strides = [1, 1]} : vector<3x128xf32> to vector<1x128xf32>
    %8 = arith.extf %6 : vector<32x1xbf16> to vector<32x1xf32>
    %9 = vector.broadcast %8 : vector<32x1xf32> to vector<32x128xf32>
    %10 = vector.broadcast %7 : vector<1x128xf32> to vector<32x128xf32>
    %11 = arith.mulf %9, %10 : vector<32x128xf32>
    %12 = vector.extract_strided_slice %5 {offsets = [0, 1], sizes = [32, 1], strides = [1, 1]} : vector<32x3xbf16> to vector<32x1xbf16>
    %13 = vector.extract_strided_slice %4 {offsets = [1, 0], sizes = [1, 128], strides = [1, 1]} : vector<3x128xf32> to vector<1x128xf32>
    %14 = arith.extf %12 : vector<32x1xbf16> to vector<32x1xf32>
    %15 = vector.broadcast %14 : vector<32x1xf32> to vector<32x128xf32>
    %16 = vector.broadcast %13 : vector<1x128xf32> to vector<32x128xf32>
    %17 = arith.mulf %15, %16 : vector<32x128xf32>
    %18 = arith.addf %11, %17 : vector<32x128xf32>
    %19 = vector.extract_strided_slice %5 {offsets = [0, 2], sizes = [32, 1], strides = [1, 1]} : vector<32x3xbf16> to vector<32x1xbf16>
    %20 = vector.extract_strided_slice %4 {offsets = [2, 0], sizes = [1, 128], strides = [1, 1]} : vector<3x128xf32> to vector<1x128xf32>
    %21 = arith.extf %19 : vector<32x1xbf16> to vector<32x1xf32>
    %22 = vector.broadcast %21 : vector<32x1xf32> to vector<32x128xf32>
    %23 = vector.broadcast %20 : vector<1x128xf32> to vector<32x128xf32>
    %24 = arith.mulf %22, %23 : vector<32x128xf32>
    %25 = arith.addf %18, %24 : vector<32x128xf32>
    %c0_5 = arith.constant 0 : index
    %c0_6 = arith.constant 0 : index
    %26 = vector.load %arg4[%c0_5, %c0_6] : memref<32x1xf32, #tpu.memory_space<vmem>>, vector<32x1xf32>
    %27 = vector.broadcast %26 : vector<32x1xf32> to vector<32x128xf32>
    %28 = arith.addf %25, %27 : vector<32x128xf32>
    %cst = arith.constant 0.000000e+00 : f32
    %29 = vector.broadcast %cst : f32 to vector<32x128xf32>
    %30 = arith.maximumf %28, %29 : vector<32x128xf32>
    %c0_7 = arith.constant 0 : index
    %c0_8 = arith.constant 0 : index
    %31 = vector.load %arg5[%c0_7, %c0_8] : memref<64x32xbf16, #tpu.memory_space<vmem>>, vector<64x32xbf16>
    %32 = arith.truncf %30 : vector<32x128xf32> to vector<32x128xbf16>
    %cst_9 = arith.constant dense<0.000000e+00> : vector<64x128xf32>
    %33 = tpu.matmul %31, %32, %cst_9 {dimension_numbers = #tpu.dot_dimension_numbers<[1], [0], [0], [1], [0, 0, 1, 1], [], []>} : vector<64x32xbf16>, vector<32x128xbf16>, vector<64x128xf32> -> vector<64x128xf32>
    %c0_10 = arith.constant 0 : index
    %c0_11 = arith.constant 0 : index
    %34 = vector.load %arg6[%c0_10, %c0_11] : memref<64x1xf32, #tpu.memory_space<vmem>>, vector<64x1xf32>
    %35 = vector.broadcast %34 : vector<64x1xf32> to vector<64x128xf32>
    %36 = arith.addf %33, %35 : vector<64x128xf32>
    %cst_12 = arith.constant 0.000000e+00 : f32
    %37 = vector.broadcast %cst_12 : f32 to vector<64x128xf32>
    %38 = arith.maximumf %36, %37 : vector<64x128xf32>
    %c0_13 = arith.constant 0 : index
    %c0_14 = arith.constant 0 : index
    %39 = vector.load %arg7[%c0_13, %c0_14] : memref<64x64xbf16, #tpu.memory_space<vmem>>, vector<64x64xbf16>
    %40 = arith.truncf %38 : vector<64x128xf32> to vector<64x128xbf16>
    %cst_15 = arith.constant dense<0.000000e+00> : vector<64x128xf32>
    %41 = tpu.matmul %39, %40, %cst_15 {dimension_numbers = #tpu.dot_dimension_numbers<[1], [0], [0], [1], [0, 0, 1, 1], [], []>} : vector<64x64xbf16>, vector<64x128xbf16>, vector<64x128xf32> -> vector<64x128xf32>
    %c0_16 = arith.constant 0 : index
    %c0_17 = arith.constant 0 : index
    %42 = vector.load %arg8[%c0_16, %c0_17] : memref<64x1xf32, #tpu.memory_space<vmem>>, vector<64x1xf32>
    %43 = vector.broadcast %42 : vector<64x1xf32> to vector<64x128xf32>
    %44 = arith.addf %41, %43 : vector<64x128xf32>
    %c0_18 = arith.constant 0 : index
    %c0_19 = arith.constant 0 : index
    %c0_20 = arith.constant 0 : index
    %45 = vector.load %arg9[%c0_18, %c0_19, %c0_20] : memref<1x64x1xf32, #tpu.memory_space<vmem>>, vector<1x64x1xf32>
    %46 = vector.shape_cast %45 : vector<1x64x1xf32> to vector<64x1xf32>
    %cst_21 = arith.constant dense<0xFF800000> : vector<64xf32>
    %47 = vector.multi_reduction <maximumf>, %44, %cst_21 [1] : vector<64x128xf32> to vector<64xf32>
    %48 = vector.shape_cast %47 : vector<64xf32> to vector<64x1xf32>
    %49 = arith.maximumf %46, %48 : vector<64x1xf32>
    %c0_22 = arith.constant 0 : index
    %c0_23 = arith.constant 0 : index
    %c0_24 = arith.constant 0 : index
    %50 = vector.load %arg9[%c0_22, %c0_23, %c0_24] : memref<1x64x1xf32, #tpu.memory_space<vmem>>, vector<1x64x1xf32>
    %51 = vector.shape_cast %50 : vector<1x64x1xf32> to vector<64x1xf32>
    %52 = vector.shape_cast %49 : vector<64x1xf32> to vector<1x64x1xf32>
    tpu.vector_store %arg9[%c0_22, %c0_23, %c0_24], %52 {strides = array<i32>} : memref<1x64x1xf32, #tpu.memory_space<vmem>>, vector<1x64x1xf32>,
    return
  }
  func.func @transform_0(%arg0: i32, %arg1: i32) -> (i32, i32, i32) {
    %c0_i32 = arith.constant 0 : i32
    %c0_i32_0 = arith.constant 0 : i32
    return %arg0, %c0_i32, %arg1 : i32, i32, i32
  }
  func.func @transform_1(%arg0: i32, %arg1: i32) -> (i32, i32) {
    %c0_i32 = arith.constant 0 : i32
    %c0_i32_0 = arith.constant 0 : i32
    %c0_i32_1 = arith.constant 0 : i32
    return %c0_i32, %c0_i32_0 : i32, i32
  }
  func.func @transform_2(%arg0: i32, %arg1: i32) -> (i32, i32) {
    %c0_i32 = arith.constant 0 : i32
    %c0_i32_0 = arith.constant 0 : i32
    %c0_i32_1 = arith.constant 0 : i32
    return %c0_i32, %c0_i32_0 : i32, i32
  }
  func.func @transform_3(%arg0: i32, %arg1: i32) -> (i32, i32) {
    %c0_i32 = arith.constant 0 : i32
    %c0_i32_0 = arith.constant 0 : i32
    %c0_i32_1 = arith.constant 0 : i32
    return %c0_i32, %c0_i32_0 : i32, i32
  }
  func.func @transform_4(%arg0: i32, %arg1: i32) -> (i32, i32) {
    %c0_i32 = arith.constant 0 : i32
    %c0_i32_0 = arith.constant 0 : i32
    %c0_i32_1 = arith.constant 0 : i32
    return %c0_i32, %c0_i32_0 : i32, i32
  }
  func.func @transform_5(%arg0: i32, %arg1: i32) -> (i32, i32) {
    %c0_i32 = arith.constant 0 : i32
    %c0_i32_0 = arith.constant 0 : i32
    %c0_i32_1 = arith.constant 0 : i32
    return %c0_i32, %c0_i32_0 : i32, i32
  }
  func.func @transform_6(%arg0: i32, %arg1: i32) -> (i32, i32) {
    %c0_i32 = arith.constant 0 : i32
    %c0_i32_0 = arith.constant 0 : i32
    %c0_i32_1 = arith.constant 0 : i32
    return %c0_i32, %c0_i32_0 : i32, i32
  }
  func.func @transform_7(%arg0: i32, %arg1: i32) -> (i32, i32, i32) {
    %c0_i32 = arith.constant 0 : i32
    %c0_i32_0 = arith.constant 0 : i32
    %c0_i32_1 = arith.constant 0 : i32
    return %arg0, %c0_i32, %c0_i32_0 : i32, i32, i32
  }
}

module attributes {stable_mosaic.version = 11 : i64} {
  func.func @_enc_head_dec_kernel(%arg0: i32, %arg1: i32, %arg2: memref<1x3x128xf32, #tpu.memory_space<vmem>>, %arg3: memref<1x64x1xf32, #tpu.memory_space<vmem>>, %arg4: memref<32x3xbf16, #tpu.memory_space<vmem>>, %arg5: memref<32x1xf32, #tpu.memory_space<vmem>>, %arg6: memref<64x32xbf16, #tpu.memory_space<vmem>>, %arg7: memref<64x1xf32, #tpu.memory_space<vmem>>, %arg8: memref<64x3xbf16, #tpu.memory_space<vmem>>, %arg9: memref<64x64xbf16, #tpu.memory_space<vmem>>, %arg10: memref<32x64xbf16, #tpu.memory_space<vmem>>, %arg11: memref<32x1xf32, #tpu.memory_space<vmem>>, %arg12: memref<3x32xbf16, #tpu.memory_space<vmem>>, %arg13: memref<3x1xf32, #tpu.memory_space<vmem>>, %arg14: memref<32x3xbf16, #tpu.memory_space<vmem>>, %arg15: memref<32x1xf32, #tpu.memory_space<vmem>>, %arg16: memref<64x32xbf16, #tpu.memory_space<vmem>>, %arg17: memref<64x1xf32, #tpu.memory_space<vmem>>, %arg18: memref<64x64xbf16, #tpu.memory_space<vmem>>, %arg19: memref<64x1xf32, #tpu.memory_space<vmem>>, %arg20: memref<1x3x128xf32, #tpu.memory_space<vmem>>, %arg21: memref<1x64x1xf32, #tpu.memory_space<vmem>>) attributes {dimension_semantics = [#tpu.dimension_semantics<parallel>, #tpu.dimension_semantics<arbitrary>], iteration_bounds = array<i64: 2, 1>, scalar_prefetch = 0 : i64, scratch_operands = 0 : i64, tpu.core_type = #tpu.core_type<tc>, window_params = [{transform_indices = @transform_0, window_bounds = array<i64: 1, 3, 128>}, {transform_indices = @transform_1, window_bounds = array<i64: 1, 64, 1>}, {pipeline_mode = #tpu.pipeline_mode<synchronous>, transform_indices = @transform_2, window_bounds = array<i64: 32, 3>}, {pipeline_mode = #tpu.pipeline_mode<synchronous>, transform_indices = @transform_3, window_bounds = array<i64: 32, 1>}, {pipeline_mode = #tpu.pipeline_mode<synchronous>, transform_indices = @transform_4, window_bounds = array<i64: 64, 32>}, {pipeline_mode = #tpu.pipeline_mode<synchronous>, transform_indices = @transform_5, window_bounds = array<i64: 64, 1>}, {pipeline_mode = #tpu.pipeline_mode<synchronous>, transform_indices = @transform_6, window_bounds = array<i64: 64, 3>}, {pipeline_mode = #tpu.pipeline_mode<synchronous>, transform_indices = @transform_7, window_bounds = array<i64: 64, 64>}, {pipeline_mode = #tpu.pipeline_mode<synchronous>, transform_indices = @transform_8, window_bounds = array<i64: 32, 64>}, {pipeline_mode = #tpu.pipeline_mode<synchronous>, transform_indices = @transform_9, window_bounds = array<i64: 32, 1>}, {pipeline_mode = #tpu.pipeline_mode<synchronous>, transform_indices = @transform_10, window_bounds = array<i64: 3, 32>}, {pipeline_mode = #tpu.pipeline_mode<synchronous>, transform_indices = @transform_11, window_bounds = array<i64: 3, 1>}, {pipeline_mode = #tpu.pipeline_mode<synchronous>, transform_indices = @transform_12, window_bounds = array<i64: 32, 3>}, {pipeline_mode = #tpu.pipeline_mode<synchronous>, transform_indices = @transform_13, window_bounds = array<i64: 32, 1>}, {pipeline_mode = #tpu.pipeline_mode<synchronous>, transform_indices = @transform_14, window_bounds = array<i64: 64, 32>}, {pipeline_mode = #tpu.pipeline_mode<synchronous>, transform_indices = @transform_15, window_bounds = array<i64: 64, 1>}, {pipeline_mode = #tpu.pipeline_mode<synchronous>, transform_indices = @transform_16, window_bounds = array<i64: 64, 64>}, {pipeline_mode = #tpu.pipeline_mode<synchronous>, transform_indices = @transform_17, window_bounds = array<i64: 64, 1>}, {transform_indices = @transform_18, window_bounds = array<i64: 1, 3, 128>}, {transform_indices = @transform_19, window_bounds = array<i64: 1, 64, 1>}]} {
    %c0_i32 = arith.constant 0 : i32
    %0 = arith.cmpi eq, %arg1, %c0_i32 : i32
    %1 = arith.extui %0 : i1 to i32
    %c0_i32_0 = arith.constant 0 : i32
    %2 = arith.cmpi ne, %1, %c0_i32_0 : i32
    scf.if %2 {
      %cst_58 = arith.constant 0xFF800000 : f32
      %357 = vector.broadcast %cst_58 : f32 to vector<64x1xf32>
      %c0_59 = arith.constant 0 : index
      %c0_60 = arith.constant 0 : index
      %c0_61 = arith.constant 0 : index
      %358 = vector.load %arg21[%c0_59, %c0_60, %c0_61] : memref<1x64x1xf32, #tpu.memory_space<vmem>>, vector<1x64x1xf32>
      %359 = vector.shape_cast %358 : vector<1x64x1xf32> to vector<64x1xf32>
      %360 = vector.shape_cast %357 : vector<64x1xf32> to vector<1x64x1xf32>
      tpu.vector_store %arg21[%c0_59, %c0_60, %c0_61], %360 {strides = array<i32>} : memref<1x64x1xf32, #tpu.memory_space<vmem>>, vector<1x64x1xf32>,
    } else {
    }
    %c0 = arith.constant 0 : index
    %c0_1 = arith.constant 0 : index
    %c0_2 = arith.constant 0 : index
    %3 = vector.load %arg2[%c0, %c0_1, %c0_2] : memref<1x3x128xf32, #tpu.memory_space<vmem>>, vector<1x3x128xf32>
    %4 = vector.shape_cast %3 : vector<1x3x128xf32> to vector<3x128xf32>
    %c0_3 = arith.constant 0 : index
    %c0_4 = arith.constant 0 : index
    %5 = vector.load %arg4[%c0_3, %c0_4] : memref<32x3xbf16, #tpu.memory_space<vmem>>, vector<32x3xbf16>
    %6 = vector.extract_strided_slice %5 {offsets = [0, 0], sizes = [32, 1], strides = [1, 1]} : vector<32x3xbf16> to vector<32x1xbf16>
    %7 = vector.extract_strided_slice %4 {offsets = [0, 0], sizes = [1, 128], strides = [1, 1]} : vector<3x128xf32> to vector<1x128xf32>
    %8 = arith.extf %6 : vector<32x1xbf16> to vector<32x1xf32>
    %9 = vector.broadcast %8 : vector<32x1xf32> to vector<32x128xf32>
    %10 = vector.broadcast %7 : vector<1x128xf32> to vector<32x128xf32>
    %11 = arith.mulf %9, %10 : vector<32x128xf32>
    %12 = vector.extract_strided_slice %5 {offsets = [0, 1], sizes = [32, 1], strides = [1, 1]} : vector<32x3xbf16> to vector<32x1xbf16>
    %13 = vector.extract_strided_slice %4 {offsets = [1, 0], sizes = [1, 128], strides = [1, 1]} : vector<3x128xf32> to vector<1x128xf32>
    %14 = arith.extf %12 : vector<32x1xbf16> to vector<32x1xf32>
    %15 = vector.broadcast %14 : vector<32x1xf32> to vector<32x128xf32>
    %16 = vector.broadcast %13 : vector<1x128xf32> to vector<32x128xf32>
    %17 = arith.mulf %15, %16 : vector<32x128xf32>
    %18 = arith.addf %11, %17 : vector<32x128xf32>
    %19 = vector.extract_strided_slice %5 {offsets = [0, 2], sizes = [32, 1], strides = [1, 1]} : vector<32x3xbf16> to vector<32x1xbf16>
    %20 = vector.extract_strided_slice %4 {offsets = [2, 0], sizes = [1, 128], strides = [1, 1]} : vector<3x128xf32> to vector<1x128xf32>
    %21 = arith.extf %19 : vector<32x1xbf16> to vector<32x1xf32>
    %22 = vector.broadcast %21 : vector<32x1xf32> to vector<32x128xf32>
    %23 = vector.broadcast %20 : vector<1x128xf32> to vector<32x128xf32>
    %24 = arith.mulf %22, %23 : vector<32x128xf32>
    %25 = arith.addf %18, %24 : vector<32x128xf32>
    %c0_5 = arith.constant 0 : index
    %c0_6 = arith.constant 0 : index
    %26 = vector.load %arg5[%c0_5, %c0_6] : memref<32x1xf32, #tpu.memory_space<vmem>>, vector<32x1xf32>
    %27 = vector.broadcast %26 : vector<32x1xf32> to vector<32x128xf32>
    %28 = arith.addf %25, %27 : vector<32x128xf32>
    %cst = arith.constant 0.000000e+00 : f32
    %29 = vector.broadcast %cst : f32 to vector<32x128xf32>
    %30 = arith.maximumf %28, %29 : vector<32x128xf32>
    %c0_7 = arith.constant 0 : index
    %c0_8 = arith.constant 0 : index
    %31 = vector.load %arg6[%c0_7, %c0_8] : memref<64x32xbf16, #tpu.memory_space<vmem>>, vector<64x32xbf16>
    %32 = arith.truncf %30 : vector<32x128xf32> to vector<32x128xbf16>
    %cst_9 = arith.constant dense<0.000000e+00> : vector<64x128xf32>
    %33 = tpu.matmul %31, %32, %cst_9 {dimension_numbers = #tpu.dot_dimension_numbers<[1], [0], [0], [1], [0, 0, 1, 1], [], []>} : vector<64x32xbf16>, vector<32x128xbf16>, vector<64x128xf32> -> vector<64x128xf32>
    %c0_10 = arith.constant 0 : index
    %c0_11 = arith.constant 0 : index
    %34 = vector.load %arg7[%c0_10, %c0_11] : memref<64x1xf32, #tpu.memory_space<vmem>>, vector<64x1xf32>
    %35 = vector.broadcast %34 : vector<64x1xf32> to vector<64x128xf32>
    %36 = arith.addf %33, %35 : vector<64x128xf32>
    %cst_12 = arith.constant 0.000000e+00 : f32
    %37 = vector.broadcast %cst_12 : f32 to vector<64x128xf32>
    %38 = arith.maximumf %36, %37 : vector<64x128xf32>
    %c0_13 = arith.constant 0 : index
    %c0_14 = arith.constant 0 : index
    %39 = vector.load %arg8[%c0_13, %c0_14] : memref<64x3xbf16, #tpu.memory_space<vmem>>, vector<64x3xbf16>
    %40 = vector.extract_strided_slice %39 {offsets = [0, 0], sizes = [64, 1], strides = [1, 1]} : vector<64x3xbf16> to vector<64x1xbf16>
    %41 = vector.extract_strided_slice %4 {offsets = [0, 0], sizes = [1, 128], strides = [1, 1]} : vector<3x128xf32> to vector<1x128xf32>
    %42 = arith.extf %40 : vector<64x1xbf16> to vector<64x1xf32>
    %43 = vector.broadcast %42 : vector<64x1xf32> to vector<64x128xf32>
    %44 = vector.broadcast %41 : vector<1x128xf32> to vector<64x128xf32>
    %45 = arith.mulf %43, %44 : vector<64x128xf32>
    %46 = vector.extract_strided_slice %39 {offsets = [0, 1], sizes = [64, 1], strides = [1, 1]} : vector<64x3xbf16> to vector<64x1xbf16>
    %47 = vector.extract_strided_slice %4 {offsets = [1, 0], sizes = [1, 128], strides = [1, 1]} : vector<3x128xf32> to vector<1x128xf32>
    %48 = arith.extf %46 : vector<64x1xbf16> to vector<64x1xf32>
    %49 = vector.broadcast %48 : vector<64x1xf32> to vector<64x128xf32>
    %50 = vector.broadcast %47 : vector<1x128xf32> to vector<64x128xf32>
    %51 = arith.mulf %49, %50 : vector<64x128xf32>
    %52 = arith.addf %45, %51 : vector<64x128xf32>
    %53 = vector.extract_strided_slice %39 {offsets = [0, 2], sizes = [64, 1], strides = [1, 1]} : vector<64x3xbf16> to vector<64x1xbf16>
    %54 = vector.extract_strided_slice %4 {offsets = [2, 0], sizes = [1, 128], strides = [1, 1]} : vector<3x128xf32> to vector<1x128xf32>
    %55 = arith.extf %53 : vector<64x1xbf16> to vector<64x1xf32>
    %56 = vector.broadcast %55 : vector<64x1xf32> to vector<64x128xf32>
    %57 = vector.broadcast %54 : vector<1x128xf32> to vector<64x128xf32>
    %58 = arith.mulf %56, %57 : vector<64x128xf32>
    %59 = arith.addf %52, %58 : vector<64x128xf32>
    %c0_15 = arith.constant 0 : index
    %c0_16 = arith.constant 0 : index
    %60 = vector.load %arg9[%c0_15, %c0_16] : memref<64x64xbf16, #tpu.memory_space<vmem>>, vector<64x64xbf16>
    %61 = arith.truncf %38 : vector<64x128xf32> to vector<64x128xbf16>
    %cst_17 = arith.constant dense<0.000000e+00> : vector<64x128xf32>
    %62 = tpu.matmul %60, %61, %cst_17 {dimension_numbers = #tpu.dot_dimension_numbers<[1], [0], [0], [1], [0, 0, 1, 1], [], []>} : vector<64x64xbf16>, vector<64x128xbf16>, vector<64x128xf32> -> vector<64x128xf32>
    %63 = arith.addf %59, %62 : vector<64x128xf32>
    %c0_18 = arith.constant 0 : index
    %c0_19 = arith.constant 0 : index
    %c0_20 = arith.constant 0 : index
    %64 = vector.load %arg3[%c0_18, %c0_19, %c0_20] : memref<1x64x1xf32, #tpu.memory_space<vmem>>, vector<1x64x1xf32>
    %65 = vector.shape_cast %64 : vector<1x64x1xf32> to vector<64x1xf32>
    %66 = vector.broadcast %65 : vector<64x1xf32> to vector<64x128xf32>
    %67 = arith.addf %63, %66 : vector<64x128xf32>
    %cst_21 = arith.constant 0.000000e+00 : f32
    %68 = vector.broadcast %cst_21 : f32 to vector<64x128xf32>
    %69 = arith.maximumf %67, %68 : vector<64x128xf32>
    %c0_22 = arith.constant 0 : index
    %c0_23 = arith.constant 0 : index
    %70 = vector.load %arg10[%c0_22, %c0_23] : memref<32x64xbf16, #tpu.memory_space<vmem>>, vector<32x64xbf16>
    %71 = arith.truncf %69 : vector<64x128xf32> to vector<64x128xbf16>
    %cst_24 = arith.constant dense<0.000000e+00> : vector<32x128xf32>
    %72 = tpu.matmul %70, %71, %cst_24 {dimension_numbers = #tpu.dot_dimension_numbers<[1], [0], [0], [1], [0, 0, 1, 1], [], []>} : vector<32x64xbf16>, vector<64x128xbf16>, vector<32x128xf32> -> vector<32x128xf32>
    %c0_25 = arith.constant 0 : index
    %c0_26 = arith.constant 0 : index
    %73 = vector.load %arg11[%c0_25, %c0_26] : memref<32x1xf32, #tpu.memory_space<vmem>>, vector<32x1xf32>
    %74 = vector.broadcast %73 : vector<32x1xf32> to vector<32x128xf32>
    %75 = arith.addf %72, %74 : vector<32x128xf32>
    %cst_27 = arith.constant 0.000000e+00 : f32
    %76 = vector.broadcast %cst_27 : f32 to vector<32x128xf32>
    %77 = arith.maximumf %75, %76 : vector<32x128xf32>
    %c0_28 = arith.constant 0 : index
    %c0_29 = arith.constant 0 : index
    %78 = vector.load %arg12[%c0_28, %c0_29] : memref<3x32xbf16, #tpu.memory_space<vmem>>, vector<3x32xbf16>
    %79 = vector.extract_strided_slice %78 {offsets = [0, 0], sizes = [3, 1], strides = [1, 1]} : vector<3x32xbf16> to vector<3x1xbf16>
    %80 = vector.extract_strided_slice %77 {offsets = [0, 0], sizes = [1, 128], strides = [1, 1]} : vector<32x128xf32> to vector<1x128xf32>
    %81 = arith.extf %79 : vector<3x1xbf16> to vector<3x1xf32>
    %82 = vector.broadcast %81 : vector<3x1xf32> to vector<3x128xf32>
    %83 = vector.broadcast %80 : vector<1x128xf32> to vector<3x128xf32>
    %84 = arith.mulf %82, %83 : vector<3x128xf32>
    %85 = vector.extract_strided_slice %78 {offsets = [0, 1], sizes = [3, 1], strides = [1, 1]} : vector<3x32xbf16> to vector<3x1xbf16>
    %86 = vector.extract_strided_slice %77 {offsets = [1, 0], sizes = [1, 128], strides = [1, 1]} : vector<32x128xf32> to vector<1x128xf32>
    %87 = arith.extf %85 : vector<3x1xbf16> to vector<3x1xf32>
    %88 = vector.broadcast %87 : vector<3x1xf32> to vector<3x128xf32>
    %89 = vector.broadcast %86 : vector<1x128xf32> to vector<3x128xf32>
    %90 = arith.mulf %88, %89 : vector<3x128xf32>
    %91 = arith.addf %84, %90 : vector<3x128xf32>
    %92 = vector.extract_strided_slice %78 {offsets = [0, 2], sizes = [3, 1], strides = [1, 1]} : vector<3x32xbf16> to vector<3x1xbf16>
    %93 = vector.extract_strided_slice %77 {offsets = [2, 0], sizes = [1, 128], strides = [1, 1]} : vector<32x128xf32> to vector<1x128xf32>
    %94 = arith.extf %92 : vector<3x1xbf16> to vector<3x1xf32>
    %95 = vector.broadcast %94 : vector<3x1xf32> to vector<3x128xf32>
    %96 = vector.broadcast %93 : vector<1x128xf32> to vector<3x128xf32>
    %97 = arith.mulf %95, %96 : vector<3x128xf32>
    %98 = arith.addf %91, %97 : vector<3x128xf32>
    %99 = vector.extract_strided_slice %78 {offsets = [0, 3], sizes = [3, 1], strides = [1, 1]} : vector<3x32xbf16> to vector<3x1xbf16>
    %100 = vector.extract_strided_slice %77 {offsets = [3, 0], sizes = [1, 128], strides = [1, 1]} : vector<32x128xf32> to vector<1x128xf32>
    %101 = arith.extf %99 : vector<3x1xbf16> to vector<3x1xf32>
    %102 = vector.broadcast %101 : vector<3x1xf32> to vector<3x128xf32>
    %103 = vector.broadcast %100 : vector<1x128xf32> to vector<3x128xf32>
    %104 = arith.mulf %102, %103 : vector<3x128xf32>
    %105 = arith.addf %98, %104 : vector<3x128xf32>
    %106 = vector.extract_strided_slice %78 {offsets = [0, 4], sizes = [3, 1], strides = [1, 1]} : vector<3x32xbf16> to vector<3x1xbf16>
    %107 = vector.extract_strided_slice %77 {offsets = [4, 0], sizes = [1, 128], strides = [1, 1]} : vector<32x128xf32> to vector<1x128xf32>
    %108 = arith.extf %106 : vector<3x1xbf16> to vector<3x1xf32>
    %109 = vector.broadcast %108 : vector<3x1xf32> to vector<3x128xf32>
    %110 = vector.broadcast %107 : vector<1x128xf32> to vector<3x128xf32>
    %111 = arith.mulf %109, %110 : vector<3x128xf32>
    %112 = arith.addf %105, %111 : vector<3x128xf32>
    %113 = vector.extract_strided_slice %78 {offsets = [0, 5], sizes = [3, 1], strides = [1, 1]} : vector<3x32xbf16> to vector<3x1xbf16>
    %114 = vector.extract_strided_slice %77 {offsets = [5, 0], sizes = [1, 128], strides = [1, 1]} : vector<32x128xf32> to vector<1x128xf32>
    %115 = arith.extf %113 : vector<3x1xbf16> to vector<3x1xf32>
    %116 = vector.broadcast %115 : vector<3x1xf32> to vector<3x128xf32>
    %117 = vector.broadcast %114 : vector<1x128xf32> to vector<3x128xf32>
    %118 = arith.mulf %116, %117 : vector<3x128xf32>
    %119 = arith.addf %112, %118 : vector<3x128xf32>
    %120 = vector.extract_strided_slice %78 {offsets = [0, 6], sizes = [3, 1], strides = [1, 1]} : vector<3x32xbf16> to vector<3x1xbf16>
    %121 = vector.extract_strided_slice %77 {offsets = [6, 0], sizes = [1, 128], strides = [1, 1]} : vector<32x128xf32> to vector<1x128xf32>
    %122 = arith.extf %120 : vector<3x1xbf16> to vector<3x1xf32>
    %123 = vector.broadcast %122 : vector<3x1xf32> to vector<3x128xf32>
    %124 = vector.broadcast %121 : vector<1x128xf32> to vector<3x128xf32>
    %125 = arith.mulf %123, %124 : vector<3x128xf32>
    %126 = arith.addf %119, %125 : vector<3x128xf32>
    %127 = vector.extract_strided_slice %78 {offsets = [0, 7], sizes = [3, 1], strides = [1, 1]} : vector<3x32xbf16> to vector<3x1xbf16>
    %128 = vector.extract_strided_slice %77 {offsets = [7, 0], sizes = [1, 128], strides = [1, 1]} : vector<32x128xf32> to vector<1x128xf32>
    %129 = arith.extf %127 : vector<3x1xbf16> to vector<3x1xf32>
    %130 = vector.broadcast %129 : vector<3x1xf32> to vector<3x128xf32>
    %131 = vector.broadcast %128 : vector<1x128xf32> to vector<3x128xf32>
    %132 = arith.mulf %130, %131 : vector<3x128xf32>
    %133 = arith.addf %126, %132 : vector<3x128xf32>
    %134 = vector.extract_strided_slice %78 {offsets = [0, 8], sizes = [3, 1], strides = [1, 1]} : vector<3x32xbf16> to vector<3x1xbf16>
    %135 = vector.extract_strided_slice %77 {offsets = [8, 0], sizes = [1, 128], strides = [1, 1]} : vector<32x128xf32> to vector<1x128xf32>
    %136 = arith.extf %134 : vector<3x1xbf16> to vector<3x1xf32>
    %137 = vector.broadcast %136 : vector<3x1xf32> to vector<3x128xf32>
    %138 = vector.broadcast %135 : vector<1x128xf32> to vector<3x128xf32>
    %139 = arith.mulf %137, %138 : vector<3x128xf32>
    %140 = arith.addf %133, %139 : vector<3x128xf32>
    %141 = vector.extract_strided_slice %78 {offsets = [0, 9], sizes = [3, 1], strides = [1, 1]} : vector<3x32xbf16> to vector<3x1xbf16>
    %142 = vector.extract_strided_slice %77 {offsets = [9, 0], sizes = [1, 128], strides = [1, 1]} : vector<32x128xf32> to vector<1x128xf32>
    %143 = arith.extf %141 : vector<3x1xbf16> to vector<3x1xf32>
    %144 = vector.broadcast %143 : vector<3x1xf32> to vector<3x128xf32>
    %145 = vector.broadcast %142 : vector<1x128xf32> to vector<3x128xf32>
    %146 = arith.mulf %144, %145 : vector<3x128xf32>
    %147 = arith.addf %140, %146 : vector<3x128xf32>
    %148 = vector.extract_strided_slice %78 {offsets = [0, 10], sizes = [3, 1], strides = [1, 1]} : vector<3x32xbf16> to vector<3x1xbf16>
    %149 = vector.extract_strided_slice %77 {offsets = [10, 0], sizes = [1, 128], strides = [1, 1]} : vector<32x128xf32> to vector<1x128xf32>
    %150 = arith.extf %148 : vector<3x1xbf16> to vector<3x1xf32>
    %151 = vector.broadcast %150 : vector<3x1xf32> to vector<3x128xf32>
    %152 = vector.broadcast %149 : vector<1x128xf32> to vector<3x128xf32>
    %153 = arith.mulf %151, %152 : vector<3x128xf32>
    %154 = arith.addf %147, %153 : vector<3x128xf32>
    %155 = vector.extract_strided_slice %78 {offsets = [0, 11], sizes = [3, 1], strides = [1, 1]} : vector<3x32xbf16> to vector<3x1xbf16>
    %156 = vector.extract_strided_slice %77 {offsets = [11, 0], sizes = [1, 128], strides = [1, 1]} : vector<32x128xf32> to vector<1x128xf32>
    %157 = arith.extf %155 : vector<3x1xbf16> to vector<3x1xf32>
    %158 = vector.broadcast %157 : vector<3x1xf32> to vector<3x128xf32>
    %159 = vector.broadcast %156 : vector<1x128xf32> to vector<3x128xf32>
    %160 = arith.mulf %158, %159 : vector<3x128xf32>
    %161 = arith.addf %154, %160 : vector<3x128xf32>
    %162 = vector.extract_strided_slice %78 {offsets = [0, 12], sizes = [3, 1], strides = [1, 1]} : vector<3x32xbf16> to vector<3x1xbf16>
    %163 = vector.extract_strided_slice %77 {offsets = [12, 0], sizes = [1, 128], strides = [1, 1]} : vector<32x128xf32> to vector<1x128xf32>
    %164 = arith.extf %162 : vector<3x1xbf16> to vector<3x1xf32>
    %165 = vector.broadcast %164 : vector<3x1xf32> to vector<3x128xf32>
    %166 = vector.broadcast %163 : vector<1x128xf32> to vector<3x128xf32>
    %167 = arith.mulf %165, %166 : vector<3x128xf32>
    %168 = arith.addf %161, %167 : vector<3x128xf32>
    %169 = vector.extract_strided_slice %78 {offsets = [0, 13], sizes = [3, 1], strides = [1, 1]} : vector<3x32xbf16> to vector<3x1xbf16>
    %170 = vector.extract_strided_slice %77 {offsets = [13, 0], sizes = [1, 128], strides = [1, 1]} : vector<32x128xf32> to vector<1x128xf32>
    %171 = arith.extf %169 : vector<3x1xbf16> to vector<3x1xf32>
    %172 = vector.broadcast %171 : vector<3x1xf32> to vector<3x128xf32>
    %173 = vector.broadcast %170 : vector<1x128xf32> to vector<3x128xf32>
    %174 = arith.mulf %172, %173 : vector<3x128xf32>
    %175 = arith.addf %168, %174 : vector<3x128xf32>
    %176 = vector.extract_strided_slice %78 {offsets = [0, 14], sizes = [3, 1], strides = [1, 1]} : vector<3x32xbf16> to vector<3x1xbf16>
    %177 = vector.extract_strided_slice %77 {offsets = [14, 0], sizes = [1, 128], strides = [1, 1]} : vector<32x128xf32> to vector<1x128xf32>
    %178 = arith.extf %176 : vector<3x1xbf16> to vector<3x1xf32>
    %179 = vector.broadcast %178 : vector<3x1xf32> to vector<3x128xf32>
    %180 = vector.broadcast %177 : vector<1x128xf32> to vector<3x128xf32>
    %181 = arith.mulf %179, %180 : vector<3x128xf32>
    %182 = arith.addf %175, %181 : vector<3x128xf32>
    %183 = vector.extract_strided_slice %78 {offsets = [0, 15], sizes = [3, 1], strides = [1, 1]} : vector<3x32xbf16> to vector<3x1xbf16>
    %184 = vector.extract_strided_slice %77 {offsets = [15, 0], sizes = [1, 128], strides = [1, 1]} : vector<32x128xf32> to vector<1x128xf32>
    %185 = arith.extf %183 : vector<3x1xbf16> to vector<3x1xf32>
    %186 = vector.broadcast %185 : vector<3x1xf32> to vector<3x128xf32>
    %187 = vector.broadcast %184 : vector<1x128xf32> to vector<3x128xf32>
    %188 = arith.mulf %186, %187 : vector<3x128xf32>
    %189 = arith.addf %182, %188 : vector<3x128xf32>
    %190 = vector.extract_strided_slice %78 {offsets = [0, 16], sizes = [3, 1], strides = [1, 1]} : vector<3x32xbf16> to vector<3x1xbf16>
    %191 = vector.extract_strided_slice %77 {offsets = [16, 0], sizes = [1, 128], strides = [1, 1]} : vector<32x128xf32> to vector<1x128xf32>
    %192 = arith.extf %190 : vector<3x1xbf16> to vector<3x1xf32>
    %193 = vector.broadcast %192 : vector<3x1xf32> to vector<3x128xf32>
    %194 = vector.broadcast %191 : vector<1x128xf32> to vector<3x128xf32>
    %195 = arith.mulf %193, %194 : vector<3x128xf32>
    %196 = arith.addf %189, %195 : vector<3x128xf32>
    %197 = vector.extract_strided_slice %78 {offsets = [0, 17], sizes = [3, 1], strides = [1, 1]} : vector<3x32xbf16> to vector<3x1xbf16>
    %198 = vector.extract_strided_slice %77 {offsets = [17, 0], sizes = [1, 128], strides = [1, 1]} : vector<32x128xf32> to vector<1x128xf32>
    %199 = arith.extf %197 : vector<3x1xbf16> to vector<3x1xf32>
    %200 = vector.broadcast %199 : vector<3x1xf32> to vector<3x128xf32>
    %201 = vector.broadcast %198 : vector<1x128xf32> to vector<3x128xf32>
    %202 = arith.mulf %200, %201 : vector<3x128xf32>
    %203 = arith.addf %196, %202 : vector<3x128xf32>
    %204 = vector.extract_strided_slice %78 {offsets = [0, 18], sizes = [3, 1], strides = [1, 1]} : vector<3x32xbf16> to vector<3x1xbf16>
    %205 = vector.extract_strided_slice %77 {offsets = [18, 0], sizes = [1, 128], strides = [1, 1]} : vector<32x128xf32> to vector<1x128xf32>
    %206 = arith.extf %204 : vector<3x1xbf16> to vector<3x1xf32>
    %207 = vector.broadcast %206 : vector<3x1xf32> to vector<3x128xf32>
    %208 = vector.broadcast %205 : vector<1x128xf32> to vector<3x128xf32>
    %209 = arith.mulf %207, %208 : vector<3x128xf32>
    %210 = arith.addf %203, %209 : vector<3x128xf32>
    %211 = vector.extract_strided_slice %78 {offsets = [0, 19], sizes = [3, 1], strides = [1, 1]} : vector<3x32xbf16> to vector<3x1xbf16>
    %212 = vector.extract_strided_slice %77 {offsets = [19, 0], sizes = [1, 128], strides = [1, 1]} : vector<32x128xf32> to vector<1x128xf32>
    %213 = arith.extf %211 : vector<3x1xbf16> to vector<3x1xf32>
    %214 = vector.broadcast %213 : vector<3x1xf32> to vector<3x128xf32>
    %215 = vector.broadcast %212 : vector<1x128xf32> to vector<3x128xf32>
    %216 = arith.mulf %214, %215 : vector<3x128xf32>
    %217 = arith.addf %210, %216 : vector<3x128xf32>
    %218 = vector.extract_strided_slice %78 {offsets = [0, 20], sizes = [3, 1], strides = [1, 1]} : vector<3x32xbf16> to vector<3x1xbf16>
    %219 = vector.extract_strided_slice %77 {offsets = [20, 0], sizes = [1, 128], strides = [1, 1]} : vector<32x128xf32> to vector<1x128xf32>
    %220 = arith.extf %218 : vector<3x1xbf16> to vector<3x1xf32>
    %221 = vector.broadcast %220 : vector<3x1xf32> to vector<3x128xf32>
    %222 = vector.broadcast %219 : vector<1x128xf32> to vector<3x128xf32>
    %223 = arith.mulf %221, %222 : vector<3x128xf32>
    %224 = arith.addf %217, %223 : vector<3x128xf32>
    %225 = vector.extract_strided_slice %78 {offsets = [0, 21], sizes = [3, 1], strides = [1, 1]} : vector<3x32xbf16> to vector<3x1xbf16>
    %226 = vector.extract_strided_slice %77 {offsets = [21, 0], sizes = [1, 128], strides = [1, 1]} : vector<32x128xf32> to vector<1x128xf32>
    %227 = arith.extf %225 : vector<3x1xbf16> to vector<3x1xf32>
    %228 = vector.broadcast %227 : vector<3x1xf32> to vector<3x128xf32>
    %229 = vector.broadcast %226 : vector<1x128xf32> to vector<3x128xf32>
    %230 = arith.mulf %228, %229 : vector<3x128xf32>
    %231 = arith.addf %224, %230 : vector<3x128xf32>
    %232 = vector.extract_strided_slice %78 {offsets = [0, 22], sizes = [3, 1], strides = [1, 1]} : vector<3x32xbf16> to vector<3x1xbf16>
    %233 = vector.extract_strided_slice %77 {offsets = [22, 0], sizes = [1, 128], strides = [1, 1]} : vector<32x128xf32> to vector<1x128xf32>
    %234 = arith.extf %232 : vector<3x1xbf16> to vector<3x1xf32>
    %235 = vector.broadcast %234 : vector<3x1xf32> to vector<3x128xf32>
    %236 = vector.broadcast %233 : vector<1x128xf32> to vector<3x128xf32>
    %237 = arith.mulf %235, %236 : vector<3x128xf32>
    %238 = arith.addf %231, %237 : vector<3x128xf32>
    %239 = vector.extract_strided_slice %78 {offsets = [0, 23], sizes = [3, 1], strides = [1, 1]} : vector<3x32xbf16> to vector<3x1xbf16>
    %240 = vector.extract_strided_slice %77 {offsets = [23, 0], sizes = [1, 128], strides = [1, 1]} : vector<32x128xf32> to vector<1x128xf32>
    %241 = arith.extf %239 : vector<3x1xbf16> to vector<3x1xf32>
    %242 = vector.broadcast %241 : vector<3x1xf32> to vector<3x128xf32>
    %243 = vector.broadcast %240 : vector<1x128xf32> to vector<3x128xf32>
    %244 = arith.mulf %242, %243 : vector<3x128xf32>
    %245 = arith.addf %238, %244 : vector<3x128xf32>
    %246 = vector.extract_strided_slice %78 {offsets = [0, 24], sizes = [3, 1], strides = [1, 1]} : vector<3x32xbf16> to vector<3x1xbf16>
    %247 = vector.extract_strided_slice %77 {offsets = [24, 0], sizes = [1, 128], strides = [1, 1]} : vector<32x128xf32> to vector<1x128xf32>
    %248 = arith.extf %246 : vector<3x1xbf16> to vector<3x1xf32>
    %249 = vector.broadcast %248 : vector<3x1xf32> to vector<3x128xf32>
    %250 = vector.broadcast %247 : vector<1x128xf32> to vector<3x128xf32>
    %251 = arith.mulf %249, %250 : vector<3x128xf32>
    %252 = arith.addf %245, %251 : vector<3x128xf32>
    %253 = vector.extract_strided_slice %78 {offsets = [0, 25], sizes = [3, 1], strides = [1, 1]} : vector<3x32xbf16> to vector<3x1xbf16>
    %254 = vector.extract_strided_slice %77 {offsets = [25, 0], sizes = [1, 128], strides = [1, 1]} : vector<32x128xf32> to vector<1x128xf32>
    %255 = arith.extf %253 : vector<3x1xbf16> to vector<3x1xf32>
    %256 = vector.broadcast %255 : vector<3x1xf32> to vector<3x128xf32>
    %257 = vector.broadcast %254 : vector<1x128xf32> to vector<3x128xf32>
    %258 = arith.mulf %256, %257 : vector<3x128xf32>
    %259 = arith.addf %252, %258 : vector<3x128xf32>
    %260 = vector.extract_strided_slice %78 {offsets = [0, 26], sizes = [3, 1], strides = [1, 1]} : vector<3x32xbf16> to vector<3x1xbf16>
    %261 = vector.extract_strided_slice %77 {offsets = [26, 0], sizes = [1, 128], strides = [1, 1]} : vector<32x128xf32> to vector<1x128xf32>
    %262 = arith.extf %260 : vector<3x1xbf16> to vector<3x1xf32>
    %263 = vector.broadcast %262 : vector<3x1xf32> to vector<3x128xf32>
    %264 = vector.broadcast %261 : vector<1x128xf32> to vector<3x128xf32>
    %265 = arith.mulf %263, %264 : vector<3x128xf32>
    %266 = arith.addf %259, %265 : vector<3x128xf32>
    %267 = vector.extract_strided_slice %78 {offsets = [0, 27], sizes = [3, 1], strides = [1, 1]} : vector<3x32xbf16> to vector<3x1xbf16>
    %268 = vector.extract_strided_slice %77 {offsets = [27, 0], sizes = [1, 128], strides = [1, 1]} : vector<32x128xf32> to vector<1x128xf32>
    %269 = arith.extf %267 : vector<3x1xbf16> to vector<3x1xf32>
    %270 = vector.broadcast %269 : vector<3x1xf32> to vector<3x128xf32>
    %271 = vector.broadcast %268 : vector<1x128xf32> to vector<3x128xf32>
    %272 = arith.mulf %270, %271 : vector<3x128xf32>
    %273 = arith.addf %266, %272 : vector<3x128xf32>
    %274 = vector.extract_strided_slice %78 {offsets = [0, 28], sizes = [3, 1], strides = [1, 1]} : vector<3x32xbf16> to vector<3x1xbf16>
    %275 = vector.extract_strided_slice %77 {offsets = [28, 0], sizes = [1, 128], strides = [1, 1]} : vector<32x128xf32> to vector<1x128xf32>
    %276 = arith.extf %274 : vector<3x1xbf16> to vector<3x1xf32>
    %277 = vector.broadcast %276 : vector<3x1xf32> to vector<3x128xf32>
    %278 = vector.broadcast %275 : vector<1x128xf32> to vector<3x128xf32>
    %279 = arith.mulf %277, %278 : vector<3x128xf32>
    %280 = arith.addf %273, %279 : vector<3x128xf32>
    %281 = vector.extract_strided_slice %78 {offsets = [0, 29], sizes = [3, 1], strides = [1, 1]} : vector<3x32xbf16> to vector<3x1xbf16>
    %282 = vector.extract_strided_slice %77 {offsets = [29, 0], sizes = [1, 128], strides = [1, 1]} : vector<32x128xf32> to vector<1x128xf32>
    %283 = arith.extf %281 : vector<3x1xbf16> to vector<3x1xf32>
    %284 = vector.broadcast %283 : vector<3x1xf32> to vector<3x128xf32>
    %285 = vector.broadcast %282 : vector<1x128xf32> to vector<3x128xf32>
    %286 = arith.mulf %284, %285 : vector<3x128xf32>
    %287 = arith.addf %280, %286 : vector<3x128xf32>
    %288 = vector.extract_strided_slice %78 {offsets = [0, 30], sizes = [3, 1], strides = [1, 1]} : vector<3x32xbf16> to vector<3x1xbf16>
    %289 = vector.extract_strided_slice %77 {offsets = [30, 0], sizes = [1, 128], strides = [1, 1]} : vector<32x128xf32> to vector<1x128xf32>
    %290 = arith.extf %288 : vector<3x1xbf16> to vector<3x1xf32>
    %291 = vector.broadcast %290 : vector<3x1xf32> to vector<3x128xf32>
    %292 = vector.broadcast %289 : vector<1x128xf32> to vector<3x128xf32>
    %293 = arith.mulf %291, %292 : vector<3x128xf32>
    %294 = arith.addf %287, %293 : vector<3x128xf32>
    %295 = vector.extract_strided_slice %78 {offsets = [0, 31], sizes = [3, 1], strides = [1, 1]} : vector<3x32xbf16> to vector<3x1xbf16>
    %296 = vector.extract_strided_slice %77 {offsets = [31, 0], sizes = [1, 128], strides = [1, 1]} : vector<32x128xf32> to vector<1x128xf32>
    %297 = arith.extf %295 : vector<3x1xbf16> to vector<3x1xf32>
    %298 = vector.broadcast %297 : vector<3x1xf32> to vector<3x128xf32>
    %299 = vector.broadcast %296 : vector<1x128xf32> to vector<3x128xf32>
    %300 = arith.mulf %298, %299 : vector<3x128xf32>
    %301 = arith.addf %294, %300 : vector<3x128xf32>
    %c0_30 = arith.constant 0 : index
    %c0_31 = arith.constant 0 : index
    %302 = vector.load %arg13[%c0_30, %c0_31] : memref<3x1xf32, #tpu.memory_space<vmem>>, vector<3x1xf32>
    %303 = vector.broadcast %302 : vector<3x1xf32> to vector<3x128xf32>
    %304 = arith.addf %301, %303 : vector<3x128xf32>
    %305 = arith.addf %4, %304 : vector<3x128xf32>
    %c0_32 = arith.constant 0 : index
    %c0_33 = arith.constant 0 : index
    %c0_34 = arith.constant 0 : index
    %306 = vector.load %arg20[%c0_32, %c0_33, %c0_34] : memref<1x3x128xf32, #tpu.memory_space<vmem>>, vector<1x3x128xf32>
    %307 = vector.shape_cast %306 : vector<1x3x128xf32> to vector<3x128xf32>
    %308 = vector.shape_cast %305 : vector<3x128xf32> to vector<1x3x128xf32>
    tpu.vector_store %arg20[%c0_32, %c0_33, %c0_34], %308 {strides = array<i32>} : memref<1x3x128xf32, #tpu.memory_space<vmem>>, vector<1x3x128xf32>,
    %c0_35 = arith.constant 0 : index
    %c0_36 = arith.constant 0 : index
    %309 = vector.load %arg14[%c0_35, %c0_36] : memref<32x3xbf16, #tpu.memory_space<vmem>>, vector<32x3xbf16>
    %310 = vector.extract_strided_slice %309 {offsets = [0, 0], sizes = [32, 1], strides = [1, 1]} : vector<32x3xbf16> to vector<32x1xbf16>
    %311 = vector.extract_strided_slice %305 {offsets = [0, 0], sizes = [1, 128], strides = [1, 1]} : vector<3x128xf32> to vector<1x128xf32>
    %312 = arith.extf %310 : vector<32x1xbf16> to vector<32x1xf32>
    %313 = vector.broadcast %312 : vector<32x1xf32> to vector<32x128xf32>
    %314 = vector.broadcast %311 : vector<1x128xf32> to vector<32x128xf32>
    %315 = arith.mulf %313, %314 : vector<32x128xf32>
    %316 = vector.extract_strided_slice %309 {offsets = [0, 1], sizes = [32, 1], strides = [1, 1]} : vector<32x3xbf16> to vector<32x1xbf16>
    %317 = vector.extract_strided_slice %305 {offsets = [1, 0], sizes = [1, 128], strides = [1, 1]} : vector<3x128xf32> to vector<1x128xf32>
    %318 = arith.extf %316 : vector<32x1xbf16> to vector<32x1xf32>
    %319 = vector.broadcast %318 : vector<32x1xf32> to vector<32x128xf32>
    %320 = vector.broadcast %317 : vector<1x128xf32> to vector<32x128xf32>
    %321 = arith.mulf %319, %320 : vector<32x128xf32>
    %322 = arith.addf %315, %321 : vector<32x128xf32>
    %323 = vector.extract_strided_slice %309 {offsets = [0, 2], sizes = [32, 1], strides = [1, 1]} : vector<32x3xbf16> to vector<32x1xbf16>
    %324 = vector.extract_strided_slice %305 {offsets = [2, 0], sizes = [1, 128], strides = [1, 1]} : vector<3x128xf32> to vector<1x128xf32>
    %325 = arith.extf %323 : vector<32x1xbf16> to vector<32x1xf32>
    %326 = vector.broadcast %325 : vector<32x1xf32> to vector<32x128xf32>
    %327 = vector.broadcast %324 : vector<1x128xf32> to vector<32x128xf32>
    %328 = arith.mulf %326, %327 : vector<32x128xf32>
    %329 = arith.addf %322, %328 : vector<32x128xf32>
    %c0_37 = arith.constant 0 : index
    %c0_38 = arith.constant 0 : index
    %330 = vector.load %arg15[%c0_37, %c0_38] : memref<32x1xf32, #tpu.memory_space<vmem>>, vector<32x1xf32>
    %331 = vector.broadcast %330 : vector<32x1xf32> to vector<32x128xf32>
    %332 = arith.addf %329, %331 : vector<32x128xf32>
    %cst_39 = arith.constant 0.000000e+00 : f32
    %333 = vector.broadcast %cst_39 : f32 to vector<32x128xf32>
    %334 = arith.maximumf %332, %333 : vector<32x128xf32>
    %c0_40 = arith.constant 0 : index
    %c0_41 = arith.constant 0 : index
    %335 = vector.load %arg16[%c0_40, %c0_41] : memref<64x32xbf16, #tpu.memory_space<vmem>>, vector<64x32xbf16>
    %336 = arith.truncf %334 : vector<32x128xf32> to vector<32x128xbf16>
    %cst_42 = arith.constant dense<0.000000e+00> : vector<64x128xf32>
    %337 = tpu.matmul %335, %336, %cst_42 {dimension_numbers = #tpu.dot_dimension_numbers<[1], [0], [0], [1], [0, 0, 1, 1], [], []>} : vector<64x32xbf16>, vector<32x128xbf16>, vector<64x128xf32> -> vector<64x128xf32>
    %c0_43 = arith.constant 0 : index
    %c0_44 = arith.constant 0 : index
    %338 = vector.load %arg17[%c0_43, %c0_44] : memref<64x1xf32, #tpu.memory_space<vmem>>, vector<64x1xf32>
    %339 = vector.broadcast %338 : vector<64x1xf32> to vector<64x128xf32>
    %340 = arith.addf %337, %339 : vector<64x128xf32>
    %cst_45 = arith.constant 0.000000e+00 : f32
    %341 = vector.broadcast %cst_45 : f32 to vector<64x128xf32>
    %342 = arith.maximumf %340, %341 : vector<64x128xf32>
    %c0_46 = arith.constant 0 : index
    %c0_47 = arith.constant 0 : index
    %343 = vector.load %arg18[%c0_46, %c0_47] : memref<64x64xbf16, #tpu.memory_space<vmem>>, vector<64x64xbf16>
    %344 = arith.truncf %342 : vector<64x128xf32> to vector<64x128xbf16>
    %cst_48 = arith.constant dense<0.000000e+00> : vector<64x128xf32>
    %345 = tpu.matmul %343, %344, %cst_48 {dimension_numbers = #tpu.dot_dimension_numbers<[1], [0], [0], [1], [0, 0, 1, 1], [], []>} : vector<64x64xbf16>, vector<64x128xbf16>, vector<64x128xf32> -> vector<64x128xf32>
    %c0_49 = arith.constant 0 : index
    %c0_50 = arith.constant 0 : index
    %346 = vector.load %arg19[%c0_49, %c0_50] : memref<64x1xf32, #tpu.memory_space<vmem>>, vector<64x1xf32>
    %347 = vector.broadcast %346 : vector<64x1xf32> to vector<64x128xf32>
    %348 = arith.addf %345, %347 : vector<64x128xf32>
    %c0_51 = arith.constant 0 : index
    %c0_52 = arith.constant 0 : index
    %c0_53 = arith.constant 0 : index
    %349 = vector.load %arg21[%c0_51, %c0_52, %c0_53] : memref<1x64x1xf32, #tpu.memory_space<vmem>>, vector<1x64x1xf32>
    %350 = vector.shape_cast %349 : vector<1x64x1xf32> to vector<64x1xf32>
    %cst_54 = arith.constant dense<0xFF800000> : vector<64xf32>
    %351 = vector.multi_reduction <maximumf>, %348, %cst_54 [1] : vector<64x128xf32> to vector<64xf32>
    %352 = vector.shape_cast %351 : vector<64xf32> to vector<64x1xf32>
    %353 = arith.maximumf %350, %352 : vector<64x1xf32>
    %c0_55 = arith.constant 0 : index
    %c0_56 = arith.constant 0 : index
    %c0_57 = arith.constant 0 : index
    %354 = vector.load %arg21[%c0_55, %c0_56, %c0_57] : memref<1x64x1xf32, #tpu.memory_space<vmem>>, vector<1x64x1xf32>
    %355 = vector.shape_cast %354 : vector<1x64x1xf32> to vector<64x1xf32>
    %356 = vector.shape_cast %353 : vector<64x1xf32> to vector<1x64x1xf32>
    tpu.vector_store %arg21[%c0_55, %c0_56, %c0_57], %356 {strides = array<i32>} : memref<1x64x1xf32, #tpu.memory_space<vmem>>, vector<1x64x1xf32>,
    return
  }
  func.func @transform_0(%arg0: i32, %arg1: i32) -> (i32, i32, i32) {
    %c0_i32 = arith.constant 0 : i32
    %c0_i32_0 = arith.constant 0 : i32
    return %arg0, %c0_i32, %arg1 : i32, i32, i32
  }
  func.func @transform_1(%arg0: i32, %arg1: i32) -> (i32, i32, i32) {
    %c0_i32 = arith.constant 0 : i32
    %c0_i32_0 = arith.constant 0 : i32
    %c0_i32_1 = arith.constant 0 : i32
    return %arg0, %c0_i32, %c0_i32_0 : i32, i32, i32
  }
  func.func @transform_2(%arg0: i32, %arg1: i32) -> (i32, i32) {
    %c0_i32 = arith.constant 0 : i32
    %c0_i32_0 = arith.constant 0 : i32
    %c0_i32_1 = arith.constant 0 : i32
    return %c0_i32, %c0_i32_0 : i32, i32
  }
  func.func @transform_3(%arg0: i32, %arg1: i32) -> (i32, i32) {
    %c0_i32 = arith.constant 0 : i32
    %c0_i32_0 = arith.constant 0 : i32
    %c0_i32_1 = arith.constant 0 : i32
    return %c0_i32, %c0_i32_0 : i32, i32
  }
  func.func @transform_4(%arg0: i32, %arg1: i32) -> (i32, i32) {
    %c0_i32 = arith.constant 0 : i32
    %c0_i32_0 = arith.constant 0 : i32
    %c0_i32_1 = arith.constant 0 : i32
    return %c0_i32, %c0_i32_0 : i32, i32
  }
  func.func @transform_5(%arg0: i32, %arg1: i32) -> (i32, i32) {
    %c0_i32 = arith.constant 0 : i32
    %c0_i32_0 = arith.constant 0 : i32
    %c0_i32_1 = arith.constant 0 : i32
    return %c0_i32, %c0_i32_0 : i32, i32
  }
  func.func @transform_6(%arg0: i32, %arg1: i32) -> (i32, i32) {
    %c0_i32 = arith.constant 0 : i32
    %c0_i32_0 = arith.constant 0 : i32
    %c0_i32_1 = arith.constant 0 : i32
    return %c0_i32, %c0_i32_0 : i32, i32
  }
  func.func @transform_7(%arg0: i32, %arg1: i32) -> (i32, i32) {
    %c0_i32 = arith.constant 0 : i32
    %c0_i32_0 = arith.constant 0 : i32
    %c0_i32_1 = arith.constant 0 : i32
    return %c0_i32, %c0_i32_0 : i32, i32
  }
  func.func @transform_8(%arg0: i32, %arg1: i32) -> (i32, i32) {
    %c0_i32 = arith.constant 0 : i32
    %c0_i32_0 = arith.constant 0 : i32
    %c0_i32_1 = arith.constant 0 : i32
    return %c0_i32, %c0_i32_0 : i32, i32
  }
  func.func @transform_9(%arg0: i32, %arg1: i32) -> (i32, i32) {
    %c0_i32 = arith.constant 0 : i32
    %c0_i32_0 = arith.constant 0 : i32
    %c0_i32_1 = arith.constant 0 : i32
    return %c0_i32, %c0_i32_0 : i32, i32
  }
  func.func @transform_10(%arg0: i32, %arg1: i32) -> (i32, i32) {
    %c0_i32 = arith.constant 0 : i32
    %c0_i32_0 = arith.constant 0 : i32
    %c0_i32_1 = arith.constant 0 : i32
    return %c0_i32, %c0_i32_0 : i32, i32
  }
  func.func @transform_11(%arg0: i32, %arg1: i32) -> (i32, i32) {
    %c0_i32 = arith.constant 0 : i32
    %c0_i32_0 = arith.constant 0 : i32
    %c0_i32_1 = arith.constant 0 : i32
    return %c0_i32, %c0_i32_0 : i32, i32
  }
  func.func @transform_12(%arg0: i32, %arg1: i32) -> (i32, i32) {
    %c0_i32 = arith.constant 0 : i32
    %c0_i32_0 = arith.constant 0 : i32
    %c0_i32_1 = arith.constant 0 : i32
    return %c0_i32, %c0_i32_0 : i32, i32
  }
  func.func @transform_13(%arg0: i32, %arg1: i32) -> (i32, i32) {
    %c0_i32 = arith.constant 0 : i32
    %c0_i32_0 = arith.constant 0 : i32
    %c0_i32_1 = arith.constant 0 : i32
    return %c0_i32, %c0_i32_0 : i32, i32
  }
  func.func @transform_14(%arg0: i32, %arg1: i32) -> (i32, i32) {
    %c0_i32 = arith.constant 0 : i32
    %c0_i32_0 = arith.constant 0 : i32
    %c0_i32_1 = arith.constant 0 : i32
    return %c0_i32, %c0_i32_0 : i32, i32
  }
  func.func @transform_15(%arg0: i32, %arg1: i32) -> (i32, i32) {
    %c0_i32 = arith.constant 0 : i32
    %c0_i32_0 = arith.constant 0 : i32
    %c0_i32_1 = arith.constant 0 : i32
    return %c0_i32, %c0_i32_0 : i32, i32
  }
  func.func @transform_16(%arg0: i32, %arg1: i32) -> (i32, i32) {
    %c0_i32 = arith.constant 0 : i32
    %c0_i32_0 = arith.constant 0 : i32
    %c0_i32_1 = arith.constant 0 : i32
    return %c0_i32, %c0_i32_0 : i32, i32
  }
  func.func @transform_17(%arg0: i32, %arg1: i32) -> (i32, i32) {
    %c0_i32 = arith.constant 0 : i32
    %c0_i32_0 = arith.constant 0 : i32
    %c0_i32_1 = arith.constant 0 : i32
    return %c0_i32, %c0_i32_0 : i32, i32
  }
  func.func @transform_18(%arg0: i32, %arg1: i32) -> (i32, i32, i32) {
    %c0_i32 = arith.constant 0 : i32
    %c0_i32_0 = arith.constant 0 : i32
    return %arg0, %c0_i32, %arg1 : i32, i32, i32
  }
  func.func @transform_19(%arg0: i32, %arg1: i32) -> (i32, i32, i32) {
    %c0_i32 = arith.constant 0 : i32
    %c0_i32_0 = arith.constant 0 : i32
    %c0_i32_1 = arith.constant 0 : i32
    return %arg0, %c0_i32, %c0_i32_0 : i32, i32, i32
  }
}

</mosaic_0001>

<bundles_post_ra>
// kernel: pointnet_ed_forward.2
= control target key start
LH: loop header
LB: loop body
LE: loop exit
PB: predicated region body
PF: predicated region fallthrough
CT: control target
= control target key end

     0   :  { %s1087_s24 = smov 0   ;;  %s1089_s25 = smov 0   ;;  %s1268_s0 = inlined_call_operand.vmem [shape: f32[2,3,128], index: 0, kind: input, shape index: {}]   ;;  %s1269_s1 = inlined_call_operand.vmem [shape: bf16[32,3], index: 1, kind: input, shape index: {}]   ;;  %s1270_s2 = inlined_call_operand.vmem [shape: f32[32,1], index: 2, kind: input, shape index: {}]   ;;  %s1271_s3 = inlined_call_operand.vmem [shape: bf16[64,32], index: 3, kind: input, shape index: {}]   ;;  %s1272_s4 = inlined_call_operand.vmem [shape: f32[64,1], index: 4, kind: input, shape index: {}]   ;;  %s1273_s5 = inlined_call_operand.vmem [shape: bf16[64,64], index: 5, kind: input, shape index: {}]   ;;  %s1274_s6 = inlined_call_operand.vmem [shape: f32[64,1], index: 6, kind: input, shape index: {}]   ;;  %s1275_s7 = inlined_call_operand.vmem [shape: f32[2,64,1], index: 7, kind: output, shape index: {}]  }
   0x1   :  { %s1091_s26 = smov 0  }
   0x2 LB: > { %s29_s27 = sadd.s32 1, %s1037_s25  ;;  %p871_p0 = scmp.ge.s32.totalorder %s1041_s26, 1  ;;  %s1041_s26 = sphi %s1091_s26, %s17_s26   ;;  %s1037_s25 = sphi %s1089_s25, %s1277_s25   ;;  %s1033_s24 = sphi %s1087_s24, %s1276_s24  }
   0x3   : > { %p31_p1 = scmp.ge.s32.totalorder %s29_s27, 2  ;;  %p253_p2 = scmp.lt.s32.totalorder %s1041_s26, 3 }
   0x5   : > { %s1279_s27 = smov (%p31_p1, %s29_s27), 0  ;;  %p254_p3 = pnand %p871_p0, %p253_p2 }
   0x6   : > { %v895_v0 = vld [vmem:[%s1269_s1] sm:$0xff] (!%p254_p3)   ;;  %v902_v1 = vld [vmem:[%s1269_s1 + $0x8] sm:$0xff] (!%p254_p3)   ;;  %v1043_v2 = vmov (!%p254_p3), 2   ;;  %v1044_v3 = vmov (!%p254_p3), 0   ;;  %v1045_v10 = vmov (!%p254_p3), 1   ;;  %v408_v12 = vld [vmem:[%s1270_s2 + $0x10] sm:$0xff] (!%p254_p3)  ;;  %v342_v32 = vlaneseq (!%p254_p3) }
   0x7   : > { %257 = sbr.rel (%p254_p3) target bundleno = 783 (0x30f), region = 48  ;;  %985 = vset.pattern.permute.xlu1 (!%p254_p3), %v1043_v2  ;;  %973 = vset.pattern.permute.xlu0 (!%p254_p3), %v1044_v3  ;;  %v896_v4 = vunpack.c.l.bf16 (!%p254_p3), %v895_v0  ;;  %v897_v5 = vunpack.c.h.bf16 (!%p254_p3), %v895_v0  ;;  %v900_v6 = vunpack.c.l.bf16 (!%p254_p3), %v902_v1  ;;  %v901_v7 = vunpack.c.h.bf16 (!%p254_p3), %v902_v1  ;;  %v406_v11 = vld [vmem:[%s1270_s2] sm:$0xff] (!%p254_p3)  ;;  %v407_v13 = vld [vmem:[%s1270_s2 + $0x8] sm:$0xff] (!%p254_p3)  ;;  %v409_v15 = vld [vmem:[%s1270_s2 + $0x18] sm:$0xff] (!%p254_p3)  ;;  %p287_p4 = scmp.lt.s32.totalorder (!%p254_p3), %s1033_s24, 1 }
   0x8   : > { %v449_v14 = vld [vmem:[%s1272_s4 + $0x8] sm:$0xff] (!%p254_p3)  ;;  %v451_v16 = vld [vmem:[%s1272_s4 + $0x18] sm:$0xff] (!%p254_p3)  ;;  %v448_v17 = vld [vmem:[%s1272_s4] sm:$0xff] (!%p254_p3)  ;;  %vm516_vm0 = vcmask (!%p254_p3), 261120   ;;  %v343_v33 = vshrl.u32 (!%p254_p3), %v342_v32, 7  ;;  %vm682_vm1 = vcmask (!%p254_p3), 523264  }
   0x9   : > { %v986_v8 = vpack.i.bf16 (!%p254_p3), %v897_v5, %v896_v4  ;;  %v992_v9 = vpack.i.bf16 (!%p254_p3), %v901_v7, %v900_v6  ;;  %v453_v18 = vld [vmem:[%s1272_s4 + $0x28] sm:$0xff] (!%p254_p3)  ;;  %v450_v19 = vld [vmem:[%s1272_s4 + $0x10] sm:$0xff] (!%p254_p3)  ;;  %v455_v20 = vld [vmem:[%s1272_s4 + $0x38] sm:$0xff] (!%p254_p3)  ;;  %vm304_vm2 = vcmask (!%p254_p3), 7168  }
   0xa   : > { %v1011_v21 = vld [vmem:[%s1271_s3] sm:$0xff] (!%p254_p3)   ;;  %v615_v23 = vld [vmem:[%s1274_s6 + $0x8] sm:$0xff] (!%p254_p3)  ;;  %v454_v24 = vld [vmem:[%s1272_s4 + $0x30] sm:$0xff] (!%p254_p3)  ;;  %v344_v35 = vsub.s32 (!%p254_p3), 0, %v343_v33  ;;  %v368_v37 = vsub.s32 (!%p254_p3), 1, %v343_v33  ;;  %v396_v45 = vsub.s32 (!%p254_p3), 2, %v343_v33 }
   0xb   : > { %987 = vperm.xlu1 (!%p254_p3), %985, %v986_v8   ;;  %975 = vperm.xlu0 (!%p254_p3), %973, %v986_v8   ;;  %v452_v22 = vld [vmem:[%s1272_s4 + $0x20] sm:$0xff] (!%p254_p3)  ;;  %v617_v25 = vld [vmem:[%s1274_s6 + $0x18] sm:$0xff] (!%p254_p3)  ;;  %v619_v27 = vld [vmem:[%s1274_s6 + $0x28] sm:$0xff] (!%p254_p3) }
   0xc   : > { %921 = vmatprep.mubr.msk.bf16.mxu0 (!%p254_p3), %vm516_vm0, %v1011_v21  ;;  %v614_v26 = vld [vmem:[%s1274_s6] sm:$0xff] (!%p254_p3)  ;;  %v616_v28 = vld [vmem:[%s1274_s6 + $0x10] sm:$0xff] (!%p254_p3)  ;;  %v621_v29 = vld [vmem:[%s1274_s6 + $0x38] sm:$0xff] (!%p254_p3) }
   0xd   : > { %v618_v30 = vld [vmem:[%s1274_s6 + $0x20] sm:$0xff] (!%p254_p3)  ;;  %v620_v31 = vld [vmem:[%s1274_s6 + $0x30] sm:$0xff] (!%p254_p3) }
   0xe   : > { %s1281_s24 = smov (!%p287_p4, %s1033_s24), 1  ;;  %v1015_v32 = vld [vmem:[%s1273_s5] sm:$0xff]  }
   0xf   : > { %991 = vset.pattern.permute.xlu1 %v1044_v3  ;;  %979 = vset.pattern.permute.xlu0 %v1045_v10  ;;  %s872_s13 = sshll.u32 %s1281_s24, 2  ;;  %s893_s12 = sshll.u32 %s1281_s24, 6 }
  0x10   : > { %993 = vperm.xlu1 %991, %v992_v9   ;;  %981 = vperm.xlu0 %979, %v986_v8   ;;  %s293_s16 = scalar_lea.vmem %s1268_s0, %s872_s13  ;;  %s1217_s15 = scalar_lea.vmem %s1275_s7, %s893_s12 }
  0x11   : > { %v313_v38 = vld [vmem:[%s293_s16] sm:$0x7]  ;;  %937 = vmatprep.mubr.msk.bf16.mxu1 %vm682_vm1, %v1015_v32 }
  0x12   : > { %v345_v40 = vrot.slane %v313_v38, %v344_v35  ;;  %v369_v41 = vrot.slane %v313_v38, %v368_v37  ;;  %v397_v54 = vrot.slane %v313_v38, %v396_v45 }
  0x14   : > { %997 = vset.pattern.permute.xlu1 %v1045_v10  ;;  %1003 = vset.pattern.permute.xlu0 %v1043_v2 }
  0x15   : > { %999 = vperm.xlu1 %997, %v992_v9   ;;  %1005 = vperm.xlu0 %1003, %v992_v9  }
  0x19   : > { %1009 = vset.pattern.permute.xlu1 %v1044_v3  ;;  %1010 = vset.pattern.permute.xlu0 %v1044_v3 }
  0x1a   : > { %412 = vperm.xlu1 %1009, %v406_v11   ;;  %422 = vperm.xlu0 %1010, %v408_v12  }
  0x1e   : > { %417 = vperm.xlu1 %1009, %v407_v13   ;;  %463 = vperm.xlu0 %1010, %v449_v14  }
  0x22   : > { %427 = vperm.xlu1 %1009, %v409_v15   ;;  %473 = vperm.xlu0 %1010, %v451_v16  }
  0x26   : > { %458 = vperm.xlu1 %1009, %v448_v17   ;;  %483 = vperm.xlu0 %1010, %v453_v18  }
  0x2a   : > { %468 = vperm.xlu1 %1009, %v450_v19   ;;  %493 = vperm.xlu0 %1010, %v455_v20  }
  0x2e   : > { %478 = vperm.xlu1 %1009, %v452_v22   ;;  %629 = vperm.xlu0 %1010, %v615_v23  }
  0x32   : > { %488 = vperm.xlu1 %1009, %v454_v24   ;;  %639 = vperm.xlu0 %1010, %v617_v25  }
  0x36   : > { %624 = vperm.xlu1 %1009, %v614_v26   ;;  %649 = vperm.xlu0 %1010, %v619_v27  }
  0x3a   : > { %634 = vperm.xlu1 %1009, %v616_v28   ;;  %659 = vperm.xlu0 %1010, %v621_v29   ;;  %v1012_v29 = vld [vmem:[%s1271_s3 + $0x8] sm:$0xff]  }
  0x3e   : > { %644 = vperm.xlu1 %1009, %v618_v30   ;;  %v1013_v30 = vld [vmem:[%s1271_s3 + $0x10] sm:$0xff]  }
  0x42   : > { %654 = vperm.xlu1 %1009, %v620_v31   ;;  %v1014_v31 = vld [vmem:[%s1271_s3 + $0x18] sm:$0xff]  }
  0x8a   : > { %v988_v34 = vpop.permute.xlu1 %987  ;;  %v976_v36 = vpop.permute.xlu0 %975 }
  0x8b   : > { %v977_v39 = vunpack.i.l.bf16 %v976_v36  ;;  %v978_v42 = vunpack.i.h.bf16 %v976_v36  ;;  %v989_v53 = vunpack.i.l.bf16 %v988_v34  ;;  %v990_v57 = vunpack.i.h.bf16 %v988_v34 }
  0x8d   : > { %v346_v48 = vmul.f32 %v977_v39, %v345_v40  ;;  %v347_v50 = vmul.f32 %v978_v42, %v345_v40  ;;  %v398_v2 = vmul.f32 %v989_v53, %v397_v54  ;;  %v399_v6 = vmul.f32 %v990_v57, %v397_v54 }
  0x8f   : > { %v994_v43 = vpop.permute.xlu1 %993  ;;  %v982_v44 = vpop.permute.xlu0 %981 }
  0x90   : > { %v984_v46 = vunpack.i.h.bf16 %v982_v44  ;;  %v983_v47 = vunpack.i.l.bf16 %v982_v44  ;;  %v995_v51 = vunpack.i.l.bf16 %v994_v43  ;;  %v996_v61 = vunpack.i.h.bf16 %v994_v43 }
  0x92   : > { %v370_v49 = vmul.f32 %v983_v47, %v369_v41  ;;  %v371_v52 = vmul.f32 %v984_v46, %v369_v41  ;;  %v348_v63 = vmul.f32 %v995_v51, %v345_v40  ;;  %v349_v9 = vmul.f32 %v996_v61, %v345_v40 }
  0x94   : > { %v1000_v55 = vpop.permute.xlu1 %999  ;;  %v1006_v56 = vpop.permute.xlu0 %1005  ;;  %v374_v62 = vadd.f32 %v370_v49, %v346_v48  ;;  %v375_v1 = vadd.f32 %v371_v52, %v347_v50 }
  0x95   : > { %v1002_v58 = vunpack.i.h.bf16 %v1000_v55  ;;  %v1001_v59 = vunpack.i.l.bf16 %v1000_v55  ;;  %v1007_v60 = vunpack.i.l.bf16 %v1006_v56  ;;  %v1008_v4 = vunpack.i.h.bf16 %v1006_v56 }
  0x96   : > { %v402_v10 = vadd.f32 %v398_v2, %v374_v62  ;;  %v403_v11 = vadd.f32 %v399_v6, %v375_v1  ;;  %v1017_v6 = vld [vmem:[%s1273_s5 + $0x10] sm:$0xff]  }
  0x97   : > { %v372_v0 = vmul.f32 %v1001_v59, %v369_v41  ;;  %v373_v3 = vmul.f32 %v1002_v58, %v369_v41  ;;  %v400_v5 = vmul.f32 %v1007_v60, %v397_v54  ;;  %v401_v12 = vmul.f32 %v1008_v4, %v397_v54 }
  0x99   : > { %v413_v7 = vpop.permute.xlu1 %412  ;;  %v376_v8 = vadd.f32 %v372_v0, %v348_v63  ;;  %v377_v15 = vadd.f32 %v373_v3, %v349_v9  ;;  %v423_v18 = vpop.permute.xlu0 %422 }
  0x9a   : > { %v430_v13 = vadd.f32 %v413_v7, %v402_v10  ;;  %v1018_v7 = vld [vmem:[%s1273_s5 + $0x18] sm:$0xff]  }
  0x9b   : > { %v404_v14 = vadd.f32 %v400_v5, %v376_v8  ;;  %v405_v22 = vadd.f32 %v401_v12, %v377_v15  ;;  %v1016_v5 = vld [vmem:[%s1273_s5 + $0x8] sm:$0xff]   ;;  %v1046_v8 = vmov -inf  }
  0x9c   : > { %v434_v19 = vmax.f32 %v430_v13, 0.0  ;;  %307 = vst.msk [vmem:[%s1217_s15 + $0x10] sm:$0xff] %vm304_vm2, %v1046_v8  ;;  %305 = vst.msk [vmem:[%s1217_s15] sm:$0xff] %vm304_vm2, %v1046_v8 }
  0x9d   : > { %v418_v16 = vpop.permute.xlu1 %417  ;;  %v432_v20 = vadd.f32 %v423_v18, %v404_v14  ;;  %v464_v34 = vpop.permute.xlu0 %463  ;;  %306 = vst.msk [vmem:[%s1217_s15 + $0x8] sm:$0xff] %vm304_vm2, %v1046_v8  ;;  %308 = vst.msk [vmem:[%s1217_s15 + $0x18] sm:$0xff] %vm304_vm2, %v1046_v8 }
  0x9e   : > { %v431_v17 = vadd.f32 %v418_v16, %v403_v11  ;;  %309 = vst.msk [vmem:[%s1217_s15 + $0x20] sm:$0xff] %vm304_vm2, %v1046_v8  ;;  %310 = vst.msk [vmem:[%s1217_s15 + $0x28] sm:$0xff] %vm304_vm2, %v1046_v8 }
  0x9f   : > { %v436_v26 = vmax.f32 %v432_v20, 0.0  ;;  %311 = vst.msk [vmem:[%s1217_s15 + $0x30] sm:$0xff] %vm304_vm2, %v1046_v8  ;;  %312 = vst.msk [vmem:[%s1217_s15 + $0x38] sm:$0xff] %vm304_vm2, %v1046_v8 }
  0xa0   : > { %v435_v21 = vmax.f32 %v431_v17, 0.0 }
  0xa1   : > { %v428_v23 = vpop.permute.xlu1 %427  ;;  %v474_v36 = vpop.permute.xlu0 %473 }
  0xa2   : > { %v433_v24 = vadd.f32 %v428_v23, %v405_v22  ;;  %v446_v25 = vpack.c.bf16 %v435_v21, %v434_v19 }
  0xa4   : > { %v437_v27 = vmax.f32 %v433_v24, 0.0  ;;  %917 = vmatprep.subr.bf16.mxu0 %v446_v25 }
  0xa5   : > { %918 = vmatpush3.bf16.msra.mxu0 %v446_v25  ;;  %v459_v33 = vpop.permute.xlu1 %458  ;;  %v484_v45 = vpop.permute.xlu0 %483 }
  0xa6   : > { %v447_v28 = vpack.c.bf16 %v437_v27, %v436_v26 }
  0xa8   : > { %919 = vmatprep.subr.bf16.mxu0 %v447_v28 }
  0xa9   : > { %920 = vmatpush3.bf16.msra.mxu0 %v447_v28  ;;  %v469_v35 = vpop.permute.xlu1 %468  ;;  %v494_v57 = vpop.permute.xlu0 %493 }
  0xac   : > { %922 = vmatmul.mubr.msk.bf16.vlgmr.msra.gmra.mrb[0].mxu0 %vm516_vm0, %v1012_v29 }
  0xad   : > { %925 = vmatprep.mubr.msk.bf16.mxu0 %vm516_vm0, %v1013_v30  ;;  %v479_v40 = vpop.permute.xlu1 %478  ;;  %v630_v10 = vpop.permute.xlu0 %629 }
  0xb1   : > { %v489_v52 = vpop.permute.xlu1 %488  ;;  %v640_v17 = vpop.permute.xlu0 %639 }
  0xb4   : > { %926 = vmatmul.mubr.msk.bf16.gmra.mrb[4].mxu0 %vm516_vm0, %v1014_v31 }
  0xb5   : > { %v625_v9 = vpop.permute.xlu1 %624  ;;  %v650_v23 = vpop.permute.xlu0 %649 }
  0xb9   : > { %v635_v11 = vpop.permute.xlu1 %634  ;;  %v660_v31 = vpop.permute.xlu0 %659 }
  0xbd   : > { %v645_v21 = vpop.permute.xlu1 %644 }
  0xc1   : > { %v655_v29 = vpop.permute.xlu1 %654 }
 0x17f   : > { %v923_v37 = vpop.f32.mrb[0].mxu0 }
 0x180   : > { %v572_v38 = vadd.f32 %v923_v37, %v469_v35  ;;  %v563_v39 = vpop.f32.mrb[1].mxu0 }
 0x181   : > { %v564_v41 = vadd.f32 %v563_v39, %v459_v33  ;;  %v924_v42 = vpop.f32.mrb[2].mxu0  ;;  %v762_v33 = vld [vmem:[%s1217_s15 + $0x10] sm:$0xff]  ;;  %v761_v39 = vld [vmem:[%s1217_s15 + $0x8] sm:$0xff] }
 0x182   : > { %v575_v43 = vadd.f32 %v924_v42, %v474_v36  ;;  %v566_v44 = vpop.f32.mrb[3].mxu0  ;;  %v596_v47 = vmax.f32 %v572_v38, 0.0 }
 0x183   : > { %v567_v46 = vadd.f32 %v566_v44, %v464_v34  ;;  %v594_v49 = vmax.f32 %v564_v41, 0.0  ;;  %v760_v34 = vld [vmem:[%s1217_s15] sm:$0xff] }
 0x184   : > { %v597_v48 = vmax.f32 %v575_v43, 0.0 }
 0x185   : > { %v595_v50 = vmax.f32 %v567_v46, 0.0 }
 0x186   : > { %v611_v51 = vpack.c.bf16 %v597_v48, %v596_v47  ;;  %v765_v47 = vld [vmem:[%s1217_s15 + $0x28] sm:$0xff] }
 0x187   : > { %v927_v53 = vpop.f32.mrb[4].mxu0  ;;  %v610_v54 = vpack.c.bf16 %v595_v50, %v594_v49  ;;  %v766_v50 = vld [vmem:[%s1217_s15 + $0x30] sm:$0xff] }
 0x188   : > { %v588_v55 = vadd.f32 %v927_v53, %v489_v52  ;;  %v579_v56 = vpop.f32.mrb[5].mxu0  ;;  %v767_v53 = vld [vmem:[%s1217_s15 + $0x38] sm:$0xff] }
 0x189   : > { %v580_v58 = vadd.f32 %v579_v56, %v479_v40  ;;  %v928_v59 = vpop.f32.mrb[6].mxu0  ;;  %929 = vmatprep.subr.bf16.mxu1 %v610_v54  ;;  %v763_v40 = vld [vmem:[%s1217_s15 + $0x18] sm:$0xff] }
 0x18a   : > { %v591_v60 = vadd.f32 %v928_v59, %v494_v57  ;;  %v582_v61 = vpop.f32.mrb[7].mxu0  ;;  %930 = vmatpush3.bf16.msra.mxu1 %v610_v54  ;;  %v600_v63 = vmax.f32 %v588_v55, 0.0 }
 0x18b   : > { %v583_v62 = vadd.f32 %v582_v61, %v484_v45  ;;  %931 = vmatprep.subr.bf16.mxu1 %v611_v51  ;;  %v598_v1 = vmax.f32 %v580_v58, 0.0  ;;  %v764_v45 = vld [vmem:[%s1217_s15 + $0x20] sm:$0xff] }
 0x18c   : > { %v601_v0 = vmax.f32 %v591_v60, 0.0 }
 0x18d   : > { %v599_v2 = vmax.f32 %v583_v62, 0.0 }
 0x18e   : > { %v613_v3 = vpack.c.bf16 %v601_v0, %v600_v63  ;;  %932 = vmatpush3.bf16.msra.mxu1 %v611_v51 }
 0x18f   : > { %v612_v4 = vpack.c.bf16 %v599_v2, %v598_v1 }
 0x191   : > { %933 = vmatprep.subr.bf16.mxu1 %v612_v4 }
 0x192   : > { %934 = vmatpush3.bf16.msra.mxu1 %v612_v4 }
 0x193   : > { %935 = vmatprep.subr.bf16.mxu1 %v613_v3 }
 0x196   : > { %936 = vmatpush3.bf16.msra.mxu1 %v613_v3 }
 0x199   : > { %938 = vmatmul.mubr.msk.bf16.vlgmr.msra.gmra.mrb[0].mxu1 %vm682_vm1, %v1016_v5 }
 0x19a   : > { %941 = vmatprep.mubr.msk.bf16.mxu1 %vm682_vm1, %v1017_v6 }
 0x1a1   : > { %942 = vmatmul.mubr.msk.bf16.gmra.mrb[4].mxu1 %vm682_vm1, %v1018_v7 }
 0x26c   : > { %v939_v12 = vpop.f32.mrb[0].mxu1 }
 0x26d   : > { %v738_v13 = vadd.f32 %v939_v12, %v635_v11  ;;  %v729_v14 = vpop.f32.mrb[1].mxu1 }
 0x26e   : > { %v730_v15 = vadd.f32 %v729_v14, %v625_v9  ;;  %v940_v16 = vpop.f32.mrb[2].mxu1 }
 0x26f   : > { %772 = vmax.xlane.f32.xlu0 %v738_v13  ;;  %v732_v18 = vpop.f32.mrb[3].mxu1  ;;  %v741_v20 = vadd.f32 %v940_v16, %v640_v17 }
 0x270   : > { %v733_v19 = vadd.f32 %v732_v18, %v630_v10  ;;  %768 = vmax.xlane.f32.xlu1 %v730_v15 }
 0x273   : > { %770 = vmax.xlane.f32.xlu0 %v733_v19 }
 0x274   : > { %v943_v22 = vpop.f32.mrb[4].mxu1  ;;  %774 = vmax.xlane.f32.xlu1 %v741_v20 }
 0x275   : > { %v745_v24 = vpop.f32.mrb[5].mxu1  ;;  %v754_v30 = vadd.f32 %v943_v22, %v655_v29 }
 0x276   : > { %v746_v25 = vadd.f32 %v745_v24, %v645_v21  ;;  %v944_v26 = vpop.f32.mrb[6].mxu1 }
 0x277   : > { %v748_v27 = vpop.f32.mrb[7].mxu1  ;;  %v757_v32 = vadd.f32 %v944_v26, %v660_v31 }
 0x278   : > { %v749_v28 = vadd.f32 %v748_v27, %v650_v23  ;;  %776 = vmax.xlane.f32.xlu0 %v746_v25 }
 0x27a   : > { %778 = vmax.xlane.f32.xlu1 %v749_v28 }
 0x27c   : > { %780 = vmax.xlane.f32.xlu0 %v754_v30 }
 0x27e   : > { %782 = vmax.xlane.f32.xlu1 %v757_v32 }
 0x2fc   : > { %v773_v35 = vpop.xlane.xlu0 %772 }
 0x2fd   : > { %v786_v36 = vmax.f32 %v762_v33, %v773_v35  ;;  %v769_v37 = vpop.xlane.xlu1 %768 }
 0x2fe   : > { %v784_v38 = vmax.f32 %v760_v34, %v769_v37 }
 0x2ff   : > { %795 = vst.msk [vmem:[%s1217_s15 + $0x10] sm:$0xff] %vm304_vm2, %v786_v36 }
 0x300   : > { %793 = vst.msk [vmem:[%s1217_s15] sm:$0xff] %vm304_vm2, %v784_v38  ;;  %v771_v41 = vpop.xlane.xlu0 %770 }
 0x301   : > { %v785_v42 = vmax.f32 %v761_v39, %v771_v41  ;;  %v775_v43 = vpop.xlane.xlu1 %774 }
 0x302   : > { %v787_v44 = vmax.f32 %v763_v40, %v775_v43 }
 0x303   : > { %794 = vst.msk [vmem:[%s1217_s15 + $0x8] sm:$0xff] %vm304_vm2, %v785_v42 }
 0x304   : > { %796 = vst.msk [vmem:[%s1217_s15 + $0x18] sm:$0xff] %vm304_vm2, %v787_v44 }
 0x305   : > { %v777_v46 = vpop.xlane.xlu0 %776 }
 0x306   : > { %v788_v48 = vmax.f32 %v764_v45, %v777_v46 }
 0x307   : > { %v779_v49 = vpop.xlane.xlu1 %778 }
 0x308   : > { %797 = vst.msk [vmem:[%s1217_s15 + $0x20] sm:$0xff] %vm304_vm2, %v788_v48  ;;  %v789_v51 = vmax.f32 %v765_v47, %v779_v49 }
 0x309   : > { %v781_v52 = vpop.xlane.xlu0 %780 }
 0x30a   : > { %798 = vst.msk [vmem:[%s1217_s15 + $0x28] sm:$0xff] %vm304_vm2, %v789_v51  ;;  %v790_v54 = vmax.f32 %v766_v50, %v781_v52 }
 0x30b   : > { %v783_v55 = vpop.xlane.xlu1 %782 }
 0x30c   : > { %799 = vst.msk [vmem:[%s1217_s15 + $0x30] sm:$0xff] %vm304_vm2, %v790_v54  ;;  %v791_v56 = vmax.f32 %v767_v53, %v783_v55 }
 0x30e   : > { %800 = vst.msk [vmem:[%s1217_s15 + $0x38] sm:$0xff] %vm304_vm2, %v791_v56 }
 0x30f PF: > { %s17_s26 = sadd.s32 1, %s1041_s26   ;;  %s1276_s24 = smov %s1037_s25 }
 0x310   : > { %p14_p5 = scmp.ge.s32.totalorder %s17_s26, 4   ;;  %s1277_s25 = smov %s1279_s27 }
 0x312   :  { %16 = sbr.rel (!%p14_p5) target bundleno = 2 (0x2), region = 82 }

// kernel: pointnet_ed_forward.3
= control target key start
LH: loop header
LB: loop body
LE: loop exit
PB: predicated region body
PF: predicated region fallthrough
CT: control target
= control target key end

     0   :  { %s3176_s30 = smov 0   ;;  %s3178_s20 = smov 0   ;;  %s3819_s0 = inlined_call_operand.vmem [shape: f32[2,3,128], index: 0, kind: input, shape index: {}]   ;;  %s3820_s1 = inlined_call_operand.vmem [shape: f32[2,64,1], index: 1, kind: input, shape index: {}]   ;;  %s3821_s2 = inlined_call_operand.vmem [shape: bf16[32,3], index: 2, kind: input, shape index: {}]   ;;  %s3822_s3 = inlined_call_operand.vmem [shape: f32[32,1], index: 3, kind: input, shape index: {}]   ;;  %s3823_s4 = inlined_call_operand.vmem [shape: bf16[64,32], index: 4, kind: input, shape index: {}]   ;;  %s3824_s5 = inlined_call_operand.vmem [shape: f32[64,1], index: 5, kind: input, shape index: {}]   ;;  %s3825_s6 = inlined_call_operand.vmem [shape: bf16[64,3], index: 6, kind: input, shape index: {}]   ;;  %s3826_s7 = inlined_call_operand.vmem [shape: bf16[64,64], index: 7, kind: input, shape index: {}]   ;;  %s3827_s8 = inlined_call_operand.vmem [shape: bf16[32,64], index: 8, kind: input, shape index: {}]   ;;  %s3828_s9 = inlined_call_operand.vmem [shape: f32[32,1], index: 9, kind: input, shape index: {}]   ;;  %s3829_s10 = inlined_call_operand.vmem [shape: bf16[3,32], index: 10, kind: input, shape index: {}]   ;;  %s3830_s11 = inlined_call_operand.vmem [shape: f32[3,1], index: 11, kind: input, shape index: {}]   ;;  %s3831_s12 = inlined_call_operand.vmem [shape: bf16[32,3], index: 12, kind: input, shape index: {}]   ;;  %s3832_s13 = inlined_call_operand.vmem [shape: f32[32,1], index: 13, kind: input, shape index: {}]   ;;  %s3833_s14 = inlined_call_operand.vmem [shape: bf16[64,32], index: 14, kind: input, shape index: {}]   ;;  %s3834_s15 = inlined_call_operand.vmem [shape: f32[64,1], index: 15, kind: input, shape index: {}]   ;;  %s3835_s16 = inlined_call_operand.vmem [shape: bf16[64,64], index: 16, kind: input, shape index: {}]   ;;  %s3836_s17 = inlined_call_operand.vmem [shape: f32[64,1], index: 17, kind: input, shape index: {}]   ;;  %s3837_s18 = inlined_call_operand.vmem [shape: f32[2,3,128], index: 18, kind: output, shape index: {0}]   ;;  %s3838_s19 = inlined_call_operand.vmem [shape: f32[2,64,1], index: 19, kind: output, shape index: {1}]  }
   0x1   :  { %3844 = sst [smem:[#allocation2_spill]] %s3819_s0  ;;  %s3174_s0 = smov 0  }
   0x2   :  { %3845 = sst [smem:[#allocation3_spill]] %s3820_s1 }
   0x3   :  { %3846 = sst [smem:[#allocation4_spill]] %s3821_s2 }
   0x4   :  { %3847 = sst [smem:[#allocation5_spill]] %s3822_s3 }
   0x5   :  { %3848 = sst [smem:[#allocation6_spill]] %s3823_s4 }
   0x6 LB: > { %s42_s21 = sadd.s32 1, %s3034_s30  ;;  %p2571_p0 = scmp.ge.s32.totalorder %s3038_s20, 1  ;;  %s3038_s20 = sphi %s3178_s20, %s30_s20   ;;  %s3034_s30 = sphi %s3176_s30, %s3857_s30   ;;  %s3030_s0 = sphi %s3174_s0, %s3856_s0  }
   0x7   : > { %p44_p1 = scmp.ge.s32.totalorder %s42_s21, 2  ;;  %p568_p2 = scmp.lt.s32.totalorder %s3038_s20, 3 }
   0x9   : > { %s3859_s21 = smov (%p44_p1, %s42_s21), 0  ;;  %p569_p3 = pnand %p2571_p0, %p568_p2 }
   0xa   : > { %s3849_s2 = sld [smem:[#allocation4_spill]] (!%p569_p3)  ;;  %v3040_v2 = vmov (!%p569_p3), 2   ;;  %v3041_v3 = vmov (!%p569_p3), 0   ;;  %v3042_v10 = vmov (!%p569_p3), 1   ;;  %s3850_s26 = sld [smem:[#allocation5_spill]] (!%p569_p3)  ;;  %v812_v14 = vld [vmem:[%s3824_s5 + $0x8] sm:$0xff] (!%p569_p3)  ;;  %v705_v28 = vlaneseq (!%p569_p3) }
   0xb   : > { %572 = sbr.rel (%p569_p3) target bundleno = 1581 (0x62d), region = 92  ;;  %2827 = vset.pattern.permute.xlu1 (!%p569_p3), %v3040_v2  ;;  %2815 = vset.pattern.permute.xlu0 (!%p569_p3), %v3041_v3  ;;  %v814_v16 = vld [vmem:[%s3824_s5 + $0x18] sm:$0xff] (!%p569_p3)  ;;  %v811_v17 = vld [vmem:[%s3824_s5] sm:$0xff] (!%p569_p3)  ;;  %v816_v18 = vld [vmem:[%s3824_s5 + $0x28] sm:$0xff] (!%p569_p3)  ;;  %s3851_s4 = sld [smem:[#allocation6_spill]] (!%p569_p3)  ;;  %vm879_vm0 = vcmask (!%p569_p3), 261120  }
   0xc   : > { %v2627_v19 = vld [vmem:[%s3825_s6] sm:$0xff] (!%p569_p3)   ;;  %v813_v20 = vld [vmem:[%s3824_s5 + $0x10] sm:$0xff] (!%p569_p3)  ;;  %v818_v21 = vld [vmem:[%s3824_s5 + $0x38] sm:$0xff] (!%p569_p3)  ;;  %p638_p4 = scmp.lt.s32.totalorder (!%p569_p3), %s3030_s0, 1  ;;  %v3259_v29 = vshrl.u32 (!%p569_p3), %v705_v28, 7  ;;  %s3852_s27 = sld [smem:[#allocation2_spill]] (!%p569_p3) }
   0xd   : > { %v2628_v22 = vunpack.c.l.bf16 (!%p569_p3), %v2627_v19  ;;  %v2629_v23 = vunpack.c.h.bf16 (!%p569_p3), %v2627_v19  ;;  %v815_v25 = vld [vmem:[%s3824_s5 + $0x20] sm:$0xff] (!%p569_p3)  ;;  %v817_v27 = vld [vmem:[%s3824_s5 + $0x30] sm:$0xff] (!%p569_p3)  ;;  %vm1157_vm1 = vcmask (!%p569_p3), 523264   ;;  %s3853_s29 = sld [smem:[#allocation3_spill]] (!%p569_p3)  ;;  %vm667_vm2 = vcmask (!%p569_p3), 7168  }
   0xe   : > { %v3269_v31 = vsub.s32 (!%p569_p3), 0, %v3259_v29  ;;  %v3272_v33 = vsub.s32 (!%p569_p3), 1, %v3259_v29  ;;  %v3282_v41 = vsub.s32 (!%p569_p3), 2, %v3259_v29 }
   0xf   : > { %v2859_v26 = vpack.i.bf16 (!%p569_p3), %v2629_v23, %v2628_v22 }
  0x10   : > { %v2619_v0 = vld [vmem:[%s3849_s2] sm:$0xff] (!%p569_p3)   ;;  %v2650_v1 = vld [vmem:[%s3849_s2 + $0x8] sm:$0xff] (!%p569_p3)   ;;  %v771_v12 = vld [vmem:[%s3850_s26 + $0x10] sm:$0xff] (!%p569_p3) }
  0x11   : > { %v2620_v4 = vunpack.c.l.bf16 (!%p569_p3), %v2619_v0  ;;  %v2621_v5 = vunpack.c.h.bf16 (!%p569_p3), %v2619_v0  ;;  %v2624_v6 = vunpack.c.l.bf16 (!%p569_p3), %v2650_v1  ;;  %v2625_v7 = vunpack.c.h.bf16 (!%p569_p3), %v2650_v1  ;;  %v769_v11 = vld [vmem:[%s3850_s26] sm:$0xff] (!%p569_p3)  ;;  %v770_v13 = vld [vmem:[%s3850_s26 + $0x8] sm:$0xff] (!%p569_p3)  ;;  %v772_v15 = vld [vmem:[%s3850_s26 + $0x18] sm:$0xff] (!%p569_p3) }
  0x12   : > { %v2997_v24 = vld [vmem:[%s3851_s4] sm:$0xff]   ;;  %s3861_s0 = smov (!%p638_p4, %s3030_s0), 1  ;;  %v2998_v28 = vld [vmem:[%s3851_s4 + $0x8] sm:$0xff]  }
  0x13   : > { %v2828_v8 = vpack.i.bf16 %v2621_v5, %v2620_v4  ;;  %v2834_v9 = vpack.i.bf16 %v2625_v7, %v2624_v6  ;;  %2693 = vmatprep.mubr.msk.bf16.mxu0 %vm879_vm0, %v2997_v24  ;;  %s3843_s24 = sshll.u32 %s3861_s0, 2  ;;  %s3842_s23 = sshll.u32 %s3861_s0, 6 }
  0x14   : > { %s3266_s2 = scalar_lea.vmem %s3852_s27, %s3843_s24  ;;  %s3332_s1 = scalar_lea.vmem %s3853_s29, %s3842_s23 }
  0x15   : > { %2829 = vperm.xlu1 %2827, %v2828_v8   ;;  %2817 = vperm.xlu0 %2815, %v2828_v8   ;;  %v676_v34 = vld [vmem:[%s3266_s2] sm:$0x7]  ;;  %s3854_s23 = sshll.u32 %s3861_s0, 2  ;;  %s3855_s22 = sshll.u32 %s3861_s0, 6 }
  0x16   : > { %v3276_v36 = vrot.slane %v676_v34, %v3269_v31  ;;  %v3279_v37 = vrot.slane %v676_v34, %v3272_v33  ;;  %v3289_v50 = vrot.slane %v676_v34, %v3282_v41  ;;  %v3001_v34 = vld [vmem:[%s3826_s7] sm:$0xff]   ;;  %s656_s28 = scalar_lea.vmem %s3837_s18, %s3854_s23  ;;  %s3768_s24 = scalar_lea.vmem %s3838_s19, %s3855_s22 }
  0x17   : > { %2709 = vmatprep.mubr.msk.bf16.mxu1 %vm1157_vm1, %v3001_v34 }
  0x19   : > { %2833 = vset.pattern.permute.xlu1 %v3041_v3  ;;  %2821 = vset.pattern.permute.xlu0 %v3042_v10 }
  0x1a   : > { %2835 = vperm.xlu1 %2833, %v2834_v9   ;;  %2823 = vperm.xlu0 %2821, %v2828_v8  }
  0x1e   : > { %2839 = vset.pattern.permute.xlu1 %v3042_v10  ;;  %2845 = vset.pattern.permute.xlu0 %v3040_v2 }
  0x1f   : > { %2841 = vperm.xlu1 %2839, %v2834_v9   ;;  %2847 = vperm.xlu0 %2845, %v2834_v9  }
  0x23   : > { %2851 = vset.pattern.permute.xlu1 %v3041_v3  ;;  %2852 = vset.pattern.permute.xlu0 %v3041_v3 }
  0x24   : > { %775 = vperm.xlu1 %2851, %v769_v11   ;;  %785 = vperm.xlu0 %2852, %v771_v12  }
  0x28   : > { %780 = vperm.xlu1 %2851, %v770_v13   ;;  %826 = vperm.xlu0 %2852, %v812_v14  }
  0x2c   : > { %790 = vperm.xlu1 %2851, %v772_v15   ;;  %836 = vperm.xlu0 %2852, %v814_v16  }
  0x30   : > { %821 = vperm.xlu1 %2851, %v811_v17   ;;  %846 = vperm.xlu0 %2852, %v816_v18  }
  0x34   : > { %831 = vperm.xlu1 %2851, %v813_v20   ;;  %856 = vperm.xlu0 %2852, %v818_v21  }
  0x38   : > { %841 = vperm.xlu1 %2851, %v815_v25   ;;  %2858 = vset.pattern.permute.xlu0 %v3042_v10 }
  0x39   : > { %2860 = vperm.xlu0 %2858, %v2859_v26  }
  0x3c   : > { %851 = vperm.xlu1 %2851, %v817_v27  }
  0x40   : > { %2854 = vperm.xlu1 %2851, %v2859_v26  }
  0x44   : > { %2864 = vset.pattern.permute.xlu1 %v3040_v2 }
  0x45   : > { %2866 = vperm.xlu1 %2864, %v2859_v26  }
  0x49   : > { %2870 = vset.pattern.permute.xlu1 %v3041_v3 }
  0x94   : > { %v2830_v30 = vpop.permute.xlu1 %2829  ;;  %v2818_v32 = vpop.permute.xlu0 %2817 }
  0x95   : > { %v2819_v35 = vunpack.i.l.bf16 %v2818_v32  ;;  %v2820_v38 = vunpack.i.h.bf16 %v2818_v32  ;;  %v2831_v49 = vunpack.i.l.bf16 %v2830_v30  ;;  %v2832_v53 = vunpack.i.h.bf16 %v2830_v30  ;;  %v2999_v30 = vld [vmem:[%s3851_s4 + $0x10] sm:$0xff]   ;;  %v3000_v32 = vld [vmem:[%s3851_s4 + $0x18] sm:$0xff]  }
  0x97   : > { %v709_v44 = vmul.f32 %v2819_v35, %v3276_v36  ;;  %v710_v46 = vmul.f32 %v2820_v38, %v3276_v36  ;;  %v761_v62 = vmul.f32 %v2831_v49, %v3289_v50  ;;  %v762_v4 = vmul.f32 %v2832_v53, %v3289_v50  ;;  %v2651_v35 = vld [vmem:[%s3825_s6 + $0x8] sm:$0xff]   ;;  %v1245_v53 = vld [vmem:[%s3332_s1 + $0x10] sm:$0xff] }
  0x98   : > { %v2632_v38 = vunpack.c.l.bf16 %v2651_v35  ;;  %v1244_v49 = vld [vmem:[%s3332_s1 + $0x8] sm:$0xff] }
  0x99   : > { %v2836_v39 = vpop.permute.xlu1 %2835  ;;  %v2824_v40 = vpop.permute.xlu0 %2823 }
  0x9a   : > { %v2826_v42 = vunpack.i.h.bf16 %v2824_v40  ;;  %v2825_v43 = vunpack.i.l.bf16 %v2824_v40  ;;  %v2837_v47 = vunpack.i.l.bf16 %v2836_v39  ;;  %v2838_v57 = vunpack.i.h.bf16 %v2836_v39  ;;  %v2652_v40 = vld [vmem:[%s3825_s6 + $0x10] sm:$0xff]  }
  0x9b   : > { %v2633_v39 = vunpack.c.h.bf16 %v2651_v35 }
  0x9c   : > { %v733_v45 = vmul.f32 %v2825_v43, %v3279_v37  ;;  %v734_v48 = vmul.f32 %v2826_v42, %v3279_v37  ;;  %v711_v59 = vmul.f32 %v2837_v47, %v3276_v36  ;;  %v712_v7 = vmul.f32 %v2838_v57, %v3276_v36 }
  0x9d   : > { %v2871_v42 = vpack.i.bf16 %v2633_v39, %v2632_v38  ;;  %v2636_v43 = vunpack.c.l.bf16 %v2652_v40 }
  0x9e   : > { %v2842_v51 = vpop.permute.xlu1 %2841  ;;  %v2848_v52 = vpop.permute.xlu0 %2847  ;;  %v737_v58 = vadd.f32 %v733_v45, %v709_v44  ;;  %v738_v61 = vadd.f32 %v734_v48, %v710_v46  ;;  %v2637_v44 = vunpack.c.h.bf16 %v2652_v40  ;;  %v2653_v46 = vld [vmem:[%s3825_s6 + $0x18] sm:$0xff]  }
  0x9f   : > { %v2844_v54 = vunpack.i.h.bf16 %v2842_v51  ;;  %v2843_v55 = vunpack.i.l.bf16 %v2842_v51  ;;  %v2849_v56 = vunpack.i.l.bf16 %v2848_v52  ;;  %v2850_v0 = vunpack.i.h.bf16 %v2848_v52  ;;  %2872 = vperm.xlu1 %2870, %v2871_v42   ;;  %2877 = vperm.xlu0 %2858, %v2871_v42   ;;  %v1243_v52 = vld [vmem:[%s3332_s1] sm:$0xff] }
  0xa0   : > { %v765_v8 = vadd.f32 %v761_v62, %v737_v58  ;;  %v766_v9 = vadd.f32 %v762_v4, %v738_v61  ;;  %v2888_v45 = vpack.i.bf16 %v2637_v44, %v2636_v43  ;;  %v2640_v47 = vunpack.c.l.bf16 %v2653_v46  ;;  %v1247_v58 = vld [vmem:[%s3332_s1 + $0x20] sm:$0xff]  ;;  %v3002_v43 = vld [vmem:[%s3826_s7 + $0x8] sm:$0xff]   ;;  %v3003_v44 = vld [vmem:[%s3826_s7 + $0x10] sm:$0xff]  }
  0xa1   : > { %v735_v60 = vmul.f32 %v2843_v55, %v3279_v37  ;;  %v736_v63 = vmul.f32 %v2844_v54, %v3279_v37  ;;  %v763_v1 = vmul.f32 %v2849_v56, %v3289_v50  ;;  %v764_v11 = vmul.f32 %v2850_v0, %v3289_v50  ;;  %v1249_v54 = vld [vmem:[%s3332_s1 + $0x30] sm:$0xff]  ;;  %v1408_v55 = vld [vmem:[%s3829_s10] sm:$0x3]  ;;  %v1246_v56 = vld [vmem:[%s3332_s1 + $0x18] sm:$0xff] }
  0xa2   : > { %v2641_v48 = vunpack.c.h.bf16 %v2653_v46  ;;  %v3348_v57 = vunpack.c.l.bf16 %v1408_v55  ;;  %v1315_v61 = vld [vmem:[%s3828_s9] sm:$0xff]  ;;  %v3043_v46 = vmov 3   ;;  %v3049_v55 = vmov 9  }
  0xa3   : > { %v776_v5 = vpop.permute.xlu1 %775  ;;  %v739_v6 = vadd.f32 %v735_v60, %v711_v59  ;;  %v740_v14 = vadd.f32 %v736_v63, %v712_v7  ;;  %v786_v17 = vpop.permute.xlu0 %785  ;;  %2881 = vset.pattern.permute.xlu1 %v3040_v2  ;;  %2887 = vset.pattern.permute.xlu0 %v3041_v3  ;;  %v1248_v59 = vld [vmem:[%s3332_s1 + $0x28] sm:$0xff]  ;;  %v1250_v60 = vld [vmem:[%s3332_s1 + $0x38] sm:$0xff] }
  0xa4   : > { %v793_v12 = vadd.f32 %v776_v5, %v765_v8  ;;  %2883 = vperm.xlu1 %2881, %v2871_v42   ;;  %2889 = vperm.xlu0 %2887, %v2888_v45   ;;  %v2906_v51 = vpack.i.bf16 %v2641_v48, %v2640_v47  ;;  %v3044_v47 = vmov 4   ;;  %v1316_v48 = vld [vmem:[%s3828_s9 + $0x8] sm:$0xff] }
  0xa5   : > { %v767_v13 = vadd.f32 %v763_v1, %v739_v6  ;;  %v768_v21 = vadd.f32 %v764_v11, %v740_v14 }
  0xa6   : > { %v797_v18 = vmax.f32 %v793_v12, 0.0 }
  0xa7   : > { %v781_v15 = vpop.permute.xlu1 %780  ;;  %v795_v19 = vadd.f32 %v786_v17, %v767_v13  ;;  %v827_v63 = vpop.permute.xlu0 %826 }
  0xa8   : > { %v794_v16 = vadd.f32 %v781_v15, %v766_v9  ;;  %2893 = vset.pattern.permute.xlu1 %v3042_v10  ;;  %1258 = vperm.xlu0 %2887, %v1244_v49   ;;  %v3005_v49 = vld [vmem:[%s3827_s8] sm:$0xff]  }
  0xa9   : > { %v799_v25 = vmax.f32 %v795_v19, 0.0  ;;  %2895 = vperm.xlu1 %2893, %v2888_v45  }
  0xaa   : > { %v798_v20 = vmax.f32 %v794_v16, 0.0 }
  0xab   : > { %v791_v22 = vpop.permute.xlu1 %790  ;;  %v837_v1 = vpop.permute.xlu0 %836 }
  0xac   : > { %v796_v23 = vadd.f32 %v791_v22, %v768_v21  ;;  %v809_v24 = vpack.c.bf16 %v798_v20, %v797_v18  ;;  %2907 = vperm.xlu0 %2887, %v2906_v51  }
  0xad   : > { %2899 = vset.pattern.permute.xlu1 %v3041_v3 }
  0xae   : > { %v800_v26 = vmax.f32 %v796_v23, 0.0  ;;  %2689 = vmatprep.subr.bf16.mxu0 %v809_v24  ;;  %1253 = vperm.xlu1 %2899, %v1243_v52   ;;  %v3046_v52 = vmov 5  }
  0xaf   : > { %2690 = vmatpush3.bf16.msra.mxu0 %v809_v24  ;;  %v822_v62 = vpop.permute.xlu1 %821  ;;  %v847_v13 = vpop.permute.xlu0 %846 }
  0xb0   : > { %v810_v27 = vpack.c.bf16 %v800_v26, %v799_v25  ;;  %1263 = vperm.xlu0 %2887, %v1245_v53   ;;  %v3047_v53 = vmov 8  }
  0xb2   : > { %2691 = vmatprep.subr.bf16.mxu0 %v810_v27  ;;  %2900 = vset.pattern.permute.xlu1 %v3040_v2 }
  0xb3   : > { %2692 = vmatpush3.bf16.msra.mxu0 %v810_v27  ;;  %2902 = vperm.xlu1 %2900, %v2888_v45   ;;  %v832_v0 = vpop.permute.xlu1 %831  ;;  %v857_v25 = vpop.permute.xlu0 %856  ;;  %v3004_v45 = vld [vmem:[%s3826_s7 + $0x18] sm:$0xff]  }
  0xb4   : > { %2918 = vset.pattern.permute.xlu0 %v3040_v2 }
  0xb5   : > { %2920 = vperm.xlu0 %2918, %v2906_v51  }
  0xb6   : > { %2694 = vmatmul.mubr.msk.bf16.vlgmr.msra.gmra.mrb[0].mxu0 %vm879_vm0, %v2998_v28 }
  0xb7   : > { %2697 = vmatprep.mubr.msk.bf16.mxu0 %vm879_vm0, %v2999_v30  ;;  %2911 = vset.pattern.permute.xlu1 %v3042_v10  ;;  %v842_v7 = vpop.permute.xlu1 %841 }
  0xb8   : > { %2913 = vperm.xlu1 %2911, %v2906_v51   ;;  %v3045_v51 = vmov 6  }
  0xb9   : > { %2924 = vset.pattern.permute.xlu0 %v3041_v3 }
  0xba   : > { %1283 = vperm.xlu0 %2924, %v1249_v54   ;;  %v3048_v54 = vmov 7  }
  0xbb   : > { %v852_v20 = vpop.permute.xlu1 %851 }
  0xbc   : > { %2917 = vset.pattern.permute.xlu1 %v3041_v3 }
  0xbd   : > { %1268 = vperm.xlu1 %2917, %v1246_v56   ;;  %v3050_v56 = vmov 10  }
  0xbe   : > { %2698 = vmatmul.mubr.msk.bf16.gmra.mrb[4].mxu0 %vm879_vm0, %v3000_v32  ;;  %1412 = vperm.xlu0 %2924, %v3348_v57  }
  0xbf   : > { %2725 = vmatprep.mubr.msk.bf16.mxu0 %vm1157_vm1, %v3005_v49  ;;  %v3070_v49 = vmov 30  }
  0xc1   : > { %1273 = vperm.xlu1 %2917, %v1247_v58   ;;  %v3051_v58 = vmov 11  }
  0xc2   : > { %2926 = vset.pattern.permute.xlu0 %v3040_v2 }
  0xc3   : > { %1445 = vperm.xlu0 %2926, %v3348_v57  }
  0xc5   : > { %1278 = vperm.xlu1 %2917, %v1248_v59   ;;  %v3052_v59 = vmov 13  }
  0xc7   : > { %2929 = vset.pattern.permute.xlu0 %v3046_v52 }
  0xc8   : > { %1496 = vperm.xlu0 %2929, %v3348_v57  }
  0xc9   : > { %1288 = vperm.xlu1 %2917, %v1250_v60   ;;  %v3053_v60 = vmov 12  }
  0xcc   : > { %2932 = vset.pattern.permute.xlu0 %v3048_v54 }
  0xcd   : > { %1321 = vperm.xlu1 %2917, %v1315_v61   ;;  %1530 = vperm.xlu0 %2932, %v3348_v57   ;;  %v1317_v61 = vld [vmem:[%s3828_s9 + $0x10] sm:$0xff] }
  0xd1   : > { %2925 = vset.pattern.permute.xlu1 %v3042_v10  ;;  %2935 = vset.pattern.permute.xlu0 %v3050_v56 }
  0xd2   : > { %1428 = vperm.xlu1 %2925, %v3348_v57   ;;  %1581 = vperm.xlu0 %2935, %v3348_v57  }
  0xd6   : > { %2927 = vset.pattern.permute.xlu1 %v3043_v46  ;;  %2938 = vset.pattern.permute.xlu0 %v3052_v59  ;;  %v2103_v46 = vld [vmem:[%s3834_s15 + $0x30] sm:$0xff] }
  0xd7   : > { %1462 = vperm.xlu1 %2927, %v3348_v57   ;;  %1632 = vperm.xlu0 %2938, %v3348_v57  }
  0xdb   : > { %2928 = vset.pattern.permute.xlu1 %v3044_v47 }
  0xdc   : > { %1479 = vperm.xlu1 %2928, %v3348_v57  }
  0xe0   : > { %2930 = vset.pattern.permute.xlu1 %v3041_v3 }
  0xe1   : > { %1326 = vperm.xlu1 %2930, %v1316_v48  }
  0xe5   : > { %2931 = vset.pattern.permute.xlu1 %v3045_v51  ;;  %v2262_v51 = vld [vmem:[%s3836_s17] sm:$0xff] }
  0xe6   : > { %1513 = vperm.xlu1 %2931, %v3348_v57  }
  0xea   : > { %2933 = vset.pattern.permute.xlu1 %v3047_v53 }
  0xeb   : > { %1547 = vperm.xlu1 %2933, %v3348_v57  }
  0xef   : > { %2934 = vset.pattern.permute.xlu1 %v3049_v55 }
  0xf0   : > { %1564 = vperm.xlu1 %2934, %v3348_v57  }
  0xf4   : > { %2936 = vset.pattern.permute.xlu1 %v3051_v58 }
  0xf5   : > { %1598 = vperm.xlu1 %2936, %v3348_v57  }
  0xf9   : > { %2937 = vset.pattern.permute.xlu1 %v3053_v60  ;;  %v2264_v60 = vld [vmem:[%s3836_s17 + $0x10] sm:$0xff] }
  0xfa   : > { %1615 = vperm.xlu1 %2937, %v3348_v57  }
  0xfe   : > { %2939 = vset.pattern.permute.xlu1 %v3041_v3 }
  0xff   : > { %1331 = vperm.xlu1 %2939, %v1317_v61  }
 0x189   : > { %v2695_v4 = vpop.f32.mrb[0].mxu0 }
 0x18a   : > { %v935_v5 = vadd.f32 %v2695_v4, %v832_v0  ;;  %v926_v6 = vpop.f32.mrb[1].mxu0  ;;  %v3056_v0 = vmov 14   ;;  %v3058_v4 = vmov 16  }
 0x18b   : > { %v927_v8 = vadd.f32 %v926_v6, %v822_v62  ;;  %v2696_v9 = vpop.f32.mrb[2].mxu0  ;;  %v3054_v62 = vmov 15   ;;  %2940 = vset.pattern.permute.xlu1 %v3056_v0  ;;  %v3060_v6 = vmov 17   ;;  %v3071_v0 = vmov 31  }
 0x18c   : > { %v938_v11 = vadd.f32 %v2696_v9, %v837_v1  ;;  %v929_v12 = vpop.f32.mrb[3].mxu0  ;;  %v959_v15 = vmax.f32 %v935_v5, 0.0  ;;  %2941 = vset.pattern.permute.xlu0 %v3054_v62  ;;  %1649 = vperm.xlu1 %2940, %v3348_v57   ;;  %v3057_v1 = vmov 21   ;;  %v3059_v5 = vmov 23  }
 0x18d   : > { %v930_v14 = vadd.f32 %v929_v12, %v827_v63  ;;  %v957_v17 = vmax.f32 %v927_v8, 0.0  ;;  %1666 = vperm.xlu0 %2941, %v3348_v57   ;;  %v3055_v63 = vmov 18   ;;  %v3062_v8 = vmov 19  }
 0x18e   : > { %v960_v16 = vmax.f32 %v938_v11, 0.0  ;;  %v3063_v9 = vmov 29   ;;  %v3406_v11 = vpop.permute.xlu1 %2854  ;;  %v3064_v12 = vmov 20  }
 0x18f   : > { %v958_v18 = vmax.f32 %v930_v14, 0.0  ;;  %v1954_v14 = vld [vmem:[%s3830_s11] sm:$0x7]  ;;  %v2856_v52 = vunpack.i.l.bf16 %v3406_v11  ;;  %v2857_v56 = vunpack.i.h.bf16 %v3406_v11 }
 0x190   : > { %v1134_v19 = vpack.c.bf16 %v960_v16, %v959_v15  ;;  %2942 = vset.pattern.permute.xlu1 %v3058_v4  ;;  %v1318_v15 = vld [vmem:[%s3828_s9 + $0x18] sm:$0xff] }
 0x191   : > { %v2699_v21 = vpop.f32.mrb[4].mxu0  ;;  %v1133_v22 = vpack.c.bf16 %v958_v18, %v957_v17  ;;  %2944 = vset.pattern.permute.xlu0 %v3055_v63  ;;  %1683 = vperm.xlu1 %2942, %v3348_v57   ;;  %v2654_v18 = vld [vmem:[%s3831_s12 + $0x8] sm:$0xff]   ;;  %v1022_v11 = vmul.f32 %v2857_v56, %v3276_v36 }
 0x192   : > { %v951_v23 = vadd.f32 %v2699_v21, %v852_v20  ;;  %v942_v24 = vpop.f32.mrb[5].mxu0  ;;  %1717 = vperm.xlu0 %2944, %v3348_v57   ;;  %v2648_v21 = vunpack.c.l.bf16 %v2654_v18 }
 0x193   : > { %v943_v26 = vadd.f32 %v942_v24, %v842_v7  ;;  %v2700_v27 = vpop.f32.mrb[6].mxu0  ;;  %2701 = vmatprep.subr.bf16.mxu1 %v1133_v22  ;;  %v3061_v7 = vmov 26  }
 0x194   : > { %v954_v28 = vadd.f32 %v2700_v27, %v857_v25  ;;  %v945_v30 = vpop.f32.mrb[7].mxu0  ;;  %2702 = vmatpush3.bf16.msra.mxu1 %v1133_v22  ;;  %v963_v34 = vmax.f32 %v951_v23, 0.0  ;;  %v2649_v22 = vunpack.c.h.bf16 %v2654_v18  ;;  %v3065_v25 = vmov 22  }
 0x195   : > { %v946_v32 = vadd.f32 %v945_v30, %v847_v13  ;;  %2703 = vmatprep.subr.bf16.mxu1 %v1134_v19  ;;  %v961_v38 = vmax.f32 %v943_v26, 0.0  ;;  %2943 = vset.pattern.permute.xlu1 %v3060_v6  ;;  %v2643_v13 = vld [vmem:[%s3831_s12] sm:$0xff]   ;;  %v2861_v26 = vpop.permute.xlu0 %2860 }
 0x196   : > { %v964_v35 = vmax.f32 %v954_v28, 0.0  ;;  %2947 = vset.pattern.permute.xlu0 %v3057_v1  ;;  %1700 = vperm.xlu1 %2943, %v3348_v57   ;;  %v2644_v16 = vunpack.c.l.bf16 %v2643_v13  ;;  %v2645_v17 = vunpack.c.h.bf16 %v2643_v13  ;;  %v3432_v24 = vpack.i.bf16 %v2649_v22, %v2648_v21  ;;  %v2266_v13 = vld [vmem:[%s3836_s17 + $0x20] sm:$0xff] }
 0x197   : > { %v962_v39 = vmax.f32 %v946_v32, 0.0  ;;  %1768 = vperm.xlu0 %2947, %v3348_v57   ;;  %v3066_v28 = vmov 24   ;;  %v2097_v32 = vld [vmem:[%s3834_s15] sm:$0xff]  ;;  %v2862_v53 = vunpack.i.l.bf16 %v2861_v26  ;;  %v2863_v58 = vunpack.i.h.bf16 %v2861_v26 }
 0x198   : > { %v1136_v40 = vpack.c.bf16 %v964_v35, %v963_v34  ;;  %2704 = vmatpush3.bf16.msra.mxu1 %v1134_v19  ;;  %v3423_v19 = vpop.permute.xlu1 %2866  ;;  %v3426_v20 = vpack.i.bf16 %v2645_v17, %v2644_v16  ;;  %v3067_v34 = vmov 25   ;;  %v1021_v1 = vmul.f32 %v2856_v52, %v3276_v36 }
 0x199   : > { %v1135_v42 = vpack.c.bf16 %v962_v39, %v961_v38  ;;  %v2878_v30 = vpop.permute.xlu0 %2877  ;;  %v2099_v39 = vld [vmem:[%s3834_s15 + $0x10] sm:$0xff]  ;;  %v2868_v61 = vunpack.i.l.bf16 %v3423_v19  ;;  %v1061_v4 = vmul.f32 %v2862_v53, %v3279_v37 }
 0x19a   : > { %2945 = vset.pattern.permute.xlu1 %v3062_v8  ;;  %v2879_v55 = vunpack.i.l.bf16 %v2878_v30  ;;  %v2880_v63 = vunpack.i.h.bf16 %v2878_v30 }
 0x19b   : > { %2705 = vmatprep.subr.bf16.mxu1 %v1135_v42  ;;  %2950 = vset.pattern.permute.xlu0 %v3059_v5  ;;  %v2869_v5 = vunpack.i.h.bf16 %v3423_v19  ;;  %v1109_v16 = vmul.f32 %v2868_v61, %v3289_v50  ;;  %v1069_v19 = vadd.f32 %v1061_v4, %v1021_v1 }
 0x19c   : > { %2706 = vmatpush3.bf16.msra.mxu1 %v1135_v42  ;;  %1802 = vperm.xlu0 %2950, %v3348_v57   ;;  %v3429_v23 = vpop.permute.xlu1 %2872 }
 0x19d   : > { %2707 = vmatprep.subr.bf16.mxu1 %v1136_v40  ;;  %1734 = vperm.xlu1 %2945, %v3348_v57   ;;  %v3449_v38 = vpop.permute.xlu0 %2889  ;;  %v2874_v54 = vunpack.i.l.bf16 %v3429_v23  ;;  %v2875_v62 = vunpack.i.h.bf16 %v3429_v23  ;;  %v1110_v21 = vmul.f32 %v2869_v5, %v3289_v50 }
 0x19e   : > { %v2891_v17 = vunpack.i.l.bf16 %v3449_v38 }
 0x1a0   : > { %2708 = vmatpush3.bf16.msra.mxu1 %v1136_v40  ;;  %2953 = vset.pattern.permute.xlu0 %v3061_v7  ;;  %v3436_v27 = vpop.permute.xlu1 %2883  ;;  %v3068_v40 = vmov 27   ;;  %v1023_v7 = vmul.f32 %v2874_v54, %v3276_v36 }
 0x1a1   : > { %1853 = vperm.xlu0 %2953, %v3348_v57   ;;  %2946 = vset.pattern.permute.xlu1 %v3064_v12  ;;  %v2885_v8 = vunpack.i.l.bf16 %v3436_v27  ;;  %v1062_v12 = vmul.f32 %v2863_v58, %v3279_v37 }
 0x1a2   : > { %1751 = vperm.xlu1 %2946, %v3348_v57  }
 0x1a3   : > { %2710 = vmatmul.mubr.msk.bf16.vlgmr.msra.gmra.mrb[0].mxu1 %vm1157_vm1, %v3002_v43  ;;  %v2101_v43 = vld [vmem:[%s3834_s15 + $0x20] sm:$0xff]  ;;  %v1111_v26 = vmul.f32 %v2885_v8, %v3289_v50  ;;  %v1070_v30 = vadd.f32 %v1062_v12, %v1022_v11 }
 0x1a4   : > { %2713 = vmatprep.mubr.msk.bf16.mxu1 %vm1157_vm1, %v3003_v44  ;;  %v3446_v35 = vpop.permute.xlu1 %2895  ;;  %v3460_v44 = vpop.permute.xlu0 %1258 }
 0x1a5   : > { %2956 = vset.pattern.permute.xlu0 %v3063_v9  ;;  %v1063_v9 = vmul.f32 %v2879_v55, %v3279_v37 }
 0x1a6   : > { %1904 = vperm.xlu0 %2956, %v3348_v57   ;;  %2948 = vset.pattern.permute.xlu1 %v3041_v3 }
 0x1a7   : > { %1336 = vperm.xlu1 %2948, %v1318_v15   ;;  %v2886_v15 = vunpack.i.h.bf16 %v3436_v27  ;;  %v2897_v27 = vunpack.i.l.bf16 %v3446_v35 }
 0x1a8   : > { %v3455_v42 = vpop.permute.xlu1 %1253  ;;  %v3468_v48 = vpop.permute.xlu0 %2907 }
 0x1a9   : > { %v2909_v23 = vunpack.i.l.bf16 %v3468_v48  ;;  %v1065_v55 = vmul.f32 %v2897_v27, %v3279_v37 }
 0x1aa   : > { %2959 = vset.pattern.permute.xlu0 %v3041_v3 }
 0x1ab   : > { %2714 = vmatmul.mubr.msk.bf16.gmra.mrb[4].mxu1 %vm1157_vm1, %v3004_v45  ;;  %1957 = vperm.xlu0 %2959, %v1954_v14   ;;  %v3069_v45 = vmov 28   ;;  %v1024_v14 = vmul.f32 %v2875_v62, %v3276_v36  ;;  %v1027_v52 = vmul.f32 %v2909_v23, %v3276_v36 }
 0x1ac   : > { %2949 = vset.pattern.permute.xlu1 %v3065_v25  ;;  %v3466_v47 = vpop.permute.xlu1 %2902  ;;  %v1264_v6 = vpop.permute.xlu0 %1263  ;;  %v1071_v25 = vadd.f32 %v1063_v9, %v1023_v7 }
 0x1ad   : > { %1785 = vperm.xlu1 %2949, %v3348_v57   ;;  %v2904_v56 = vunpack.i.l.bf16 %v3466_v47  ;;  %v2905_v4 = vunpack.i.h.bf16 %v3466_v47 }
 0x1ae   : > { %v1119_v54 = vadd.f32 %v1111_v26, %v1071_v25 }
 0x1af   : > { %2972 = vset.pattern.permute.xlu0 %v3040_v2  ;;  %v2056_v2 = vld [vmem:[%s3832_s13 + $0x8] sm:$0xff] }
 0x1b0   : > { %2974 = vperm.xlu0 %2972, %v3426_v20   ;;  %v2914_v59 = vpop.permute.xlu1 %2913 }
 0x1b1   : > { %2951 = vset.pattern.permute.xlu1 %v3066_v28  ;;  %v2915_v22 = vunpack.i.l.bf16 %v2914_v59  ;;  %v2910_v28 = vunpack.i.h.bf16 %v3468_v48 }
 0x1b2   : > { %1819 = vperm.xlu1 %2951, %v3348_v57  }
 0x1b3   : > { %v1067_v48 = vmul.f32 %v2915_v22, %v3279_v37 }
 0x1b4   : > { %2991 = vperm.xlu0 %2972, %v3432_v24   ;;  %v1269_v18 = vpop.permute.xlu1 %1268 }
 0x1b6   : > { %2952 = vset.pattern.permute.xlu1 %v3067_v34  ;;  %v2916_v34 = vunpack.i.h.bf16 %v2914_v59 }
 0x1b7   : > { %1836 = vperm.xlu1 %2952, %v3348_v57  }
 0x1b8   : > { %2996 = vset.pattern.permute.xlu0 %v3041_v3  ;;  %v1274_v58 = vpop.permute.xlu1 %1273 }
 0x1b9   : > { %2066 = vperm.xlu0 %2996, %v2056_v2   ;;  %v2921_v2 = vpop.permute.xlu0 %2920 }
 0x1ba   : > { %v2922_v53 = vunpack.i.l.bf16 %v2921_v2 }
 0x1bb   : > { %2954 = vset.pattern.permute.xlu1 %v3068_v40 }
 0x1bc   : > { %1870 = vperm.xlu1 %2954, %v3348_v57   ;;  %v1115_v8 = vmul.f32 %v2922_v53, %v3289_v50 }
 0x1bd   : > { %2107 = vperm.xlu0 %2996, %v2097_v32   ;;  %v2268_v32 = vld [vmem:[%s3836_s17 + $0x30] sm:$0xff] }
 0x1c0   : > { %2955 = vset.pattern.permute.xlu1 %v3069_v45  ;;  %v2898_v45 = vunpack.i.h.bf16 %v3446_v35  ;;  %v1028_v35 = vmul.f32 %v2910_v28, %v3276_v36  ;;  %v1284_v28 = vpop.permute.xlu0 %1283 }
 0x1c1   : > { %2117 = vperm.xlu0 %2996, %v2099_v39   ;;  %1887 = vperm.xlu1 %2955, %v3348_v57   ;;  %v1117_v39 = vadd.f32 %v1109_v16, %v1069_v19  ;;  %v1114_v16 = vmul.f32 %v2905_v4, %v3289_v50  ;;  %v2269_v4 = vld [vmem:[%s3836_s17 + $0x38] sm:$0xff] }
 0x1c5   : > { %2127 = vperm.xlu0 %2996, %v2101_v43   ;;  %2957 = vset.pattern.permute.xlu1 %v3070_v49  ;;  %v1112_v43 = vmul.f32 %v2886_v15, %v3289_v50  ;;  %v1025_v49 = vmul.f32 %v2891_v17, %v3276_v36 }
 0x1c6   : > { %1921 = vperm.xlu1 %2957, %v3348_v57  }
 0x1c9   : > { %2137 = vperm.xlu0 %2996, %v2103_v46   ;;  %v2892_v46 = vunpack.i.h.bf16 %v3449_v38  ;;  %v2923_v38 = vunpack.i.h.bf16 %v2921_v2 }
 0x1ca   : > { %2958 = vset.pattern.permute.xlu1 %v3071_v0  ;;  %v1066_v0 = vmul.f32 %v2898_v45, %v3279_v37 }
 0x1cb   : > { %1938 = vperm.xlu1 %2958, %v3348_v57   ;;  %v1064_v57 = vmul.f32 %v2880_v63, %v3279_v37  ;;  %v1026_v1 = vmul.f32 %v2892_v46, %v3276_v36  ;;  %v1116_v36 = vmul.f32 %v2923_v38, %v3289_v50  ;;  %v2058_v38 = vld [vmem:[%s3832_s13 + $0x18] sm:$0xff] }
 0x1cd   : > { %2272 = vperm.xlu0 %2996, %v2262_v51   ;;  %v1072_v40 = vadd.f32 %v1064_v57, %v1024_v14  ;;  %v1118_v51 = vadd.f32 %v1110_v21, %v1070_v30  ;;  %v1073_v57 = vadd.f32 %v1065_v55, %v1025_v49  ;;  %v1074_v19 = vadd.f32 %v1066_v0, %v1026_v1  ;;  %v2265_v0 = vld [vmem:[%s3836_s17 + $0x18] sm:$0xff]  ;;  %v2267_v1 = vld [vmem:[%s3836_s17 + $0x28] sm:$0xff] }
 0x1cf   : > { %2960 = vset.pattern.permute.xlu1 %v3041_v3  ;;  %v1120_v63 = vadd.f32 %v1112_v43, %v1072_v40 }
 0x1d0   : > { %2962 = vperm.xlu1 %2960, %v3426_v20  }
 0x1d1   : > { %2282 = vperm.xlu0 %2996, %v2264_v60   ;;  %v1068_v60 = vmul.f32 %v2916_v34, %v3279_v37 }
 0x1d3   : > { %v1076_v47 = vadd.f32 %v1068_v60, %v1028_v35  ;;  %v2100_v60 = vld [vmem:[%s3834_s15 + $0x18] sm:$0xff] }
 0x1d4   : > { %2966 = vset.pattern.permute.xlu1 %v3042_v10 }
 0x1d5   : > { %2292 = vperm.xlu0 %2996, %v2266_v13   ;;  %2968 = vperm.xlu1 %2966, %v3426_v20   ;;  %v1075_v13 = vadd.f32 %v1067_v48, %v1027_v52  ;;  %v1113_v20 = vmul.f32 %v2904_v56, %v3289_v50  ;;  %v2055_v48 = vld [vmem:[%s3832_s13] sm:$0xff]  ;;  %v2057_v56 = vld [vmem:[%s3832_s13 + $0x10] sm:$0xff] }
 0x1d7   : > { %v1123_v23 = vadd.f32 %v1115_v8, %v1075_v13  ;;  %v1121_v27 = vadd.f32 %v1113_v20, %v1073_v57 }
 0x1d9   : > { %2302 = vperm.xlu0 %2996, %v2268_v32   ;;  %2978 = vset.pattern.permute.xlu1 %v3041_v3 }
 0x1da   : > { %2980 = vperm.xlu1 %2978, %v3432_v24  }
 0x1de   : > { %2984 = vset.pattern.permute.xlu1 %v3042_v10 }
 0x1df   : > { %2986 = vperm.xlu1 %2984, %v3432_v24  }
 0x1e3   : > { %2995 = vset.pattern.permute.xlu1 %v3041_v3  ;;  %v3006_v3 = vld [vmem:[%s3827_s8 + $0x8] sm:$0xff]  }
 0x1e4   : > { %2061 = vperm.xlu1 %2995, %v2055_v48   ;;  %v3620_v48 = vsub.s32 5, %v3259_v29 }
 0x1e8   : > { %2071 = vperm.xlu1 %2995, %v2057_v56  }
 0x1ec   : > { %2076 = vperm.xlu1 %2995, %v2058_v38  }
 0x276   : > { %v2711_v59 = vpop.f32.mrb[0].mxu1 }
 0x277   : > { %v1237_v61 = vadd.f32 %v2711_v59, %v1119_v54  ;;  %v1204_v62 = vpop.f32.mrb[1].mxu1  ;;  %v2098_v59 = vld [vmem:[%s3834_s15 + $0x8] sm:$0xff] }
 0x278   : > { %v1235_v5 = vadd.f32 %v1204_v62, %v1117_v39  ;;  %v2712_v7 = vpop.f32.mrb[2].mxu1  ;;  %v1122_v39 = vadd.f32 %v1114_v16, %v1074_v19  ;;  %2112 = vperm.xlu1 %2995, %v2098_v59   ;;  %v2104_v62 = vld [vmem:[%s3834_s15 + $0x38] sm:$0xff] }
 0x279   : > { %v1293_v9 = vadd.f32 %v1264_v6, %v1237_v61  ;;  %v1238_v11 = vadd.f32 %v2712_v7, %v1120_v63  ;;  %v1207_v12 = vpop.f32.mrb[3].mxu1  ;;  %v1279_v6 = vpop.permute.xlu1 %1278  ;;  %v2102_v61 = vld [vmem:[%s3834_s15 + $0x28] sm:$0xff] }
 0x27a   : > { %v1291_v14 = vadd.f32 %v3455_v42, %v1235_v5  ;;  %v1236_v15 = vadd.f32 %v1207_v12, %v1118_v51  ;;  %v2263_v63 = vld [vmem:[%s3836_s17 + $0x8] sm:$0xff] }
 0x27b   : > { %v1294_v37 = vadd.f32 %v1269_v18, %v1238_v11  ;;  %v1301_v21 = vmax.f32 %v1293_v9, 0.0  ;;  %v1124_v18 = vadd.f32 %v1116_v36, %v1076_v47  ;;  %v3007_v36 = vld [vmem:[%s3833_s14] sm:$0xff]  }
 0x27c   : > { %v1292_v17 = vadd.f32 %v3460_v44, %v1236_v15  ;;  %v1299_v42 = vmax.f32 %v1291_v14, 0.0  ;;  %2122 = vperm.xlu1 %2995, %v2100_v60   ;;  %v3633_v60 = vsub.s32 7, %v3259_v29 }
 0x27d   : > { %v1302_v22 = vmax.f32 %v1294_v37, 0.0  ;;  %v1289_v46 = vpop.permute.xlu1 %1288 }
 0x27e   : > { %v1300_v25 = vmax.f32 %v1292_v17, 0.0  ;;  %v2715_v26 = vpop.f32.mrb[4].mxu1  ;;  %v3072_v17 = vmov 839922192  }
 0x27f   : > { %v1241_v2 = vadd.f32 %v2715_v26, %v1123_v23  ;;  %v1220_v30 = vpop.f32.mrb[5].mxu1  ;;  %v1312_v32 = vpack.c.bf16 %v1302_v22, %v1301_v21  ;;  %v1416_v19 = vunpack.c.l.s4 %v3072_v17  ;;  %v1413_v21 = vpop.permute.xlu0 %1412 }
 0x280   : > { %v1239_v34 = vadd.f32 %v1220_v30, %v1121_v27  ;;  %v2716_v50 = vpop.f32.mrb[6].mxu1  ;;  %v1311_v40 = vpack.c.bf16 %v1300_v25, %v1299_v42  ;;  %2132 = vperm.xlu1 %2995, %v2102_v61  }
 0x281   : > { %v1297_v44 = vadd.f32 %v1284_v28, %v1241_v2  ;;  %v1242_v43 = vadd.f32 %v2716_v50, %v1124_v18  ;;  %v1223_v45 = vpop.f32.mrb[7].mxu1  ;;  %v1322_v5 = vpop.permute.xlu1 %1321  ;;  %v1417_v22 = vunpack.c.0.s8 %v1416_v19  ;;  %v3608_v50 = vsub.s32 3, %v3259_v29 }
 0x282   : > { %v1295_v49 = vadd.f32 %v1274_v58, %v1239_v34  ;;  %v1240_v51 = vadd.f32 %v1223_v45, %v1122_v39  ;;  %2717 = vmatprep.subr.bf16.mxu0 %v1311_v40 }
 0x283   : > { %v1298_v52 = vadd.f32 %v1289_v46, %v1242_v43  ;;  %2718 = vmatpush3.bf16.msra.mxu0 %v1311_v40  ;;  %v1305_v53 = vmax.f32 %v1297_v44, 0.0  ;;  %v1446_v23 = vpop.permute.xlu0 %1445  ;;  %v3601_v27 = vsub.s32 %v1417_v22, %v3259_v29 }
 0x284   : > { %v1296_v10 = vadd.f32 %v1279_v6, %v1240_v51  ;;  %2719 = vmatprep.subr.bf16.mxu0 %v1312_v32  ;;  %v1303_v24 = vmax.f32 %v1295_v49, 0.0  ;;  %2142 = vperm.xlu1 %2995, %v2104_v62   ;;  %v3617_v49 = vsub.s32 4, %v3259_v29 }
 0x285   : > { %v1306_v54 = vmax.f32 %v1298_v52, 0.0  ;;  %v1429_v7 = vpop.permute.xlu1 %1428  ;;  %v1421_v39 = vrot.slane %v1413_v21, %v3601_v27  ;;  %v1454_v45 = vrot.slane %v1446_v23, %v3601_v27 }
 0x286   : > { %v1304_v55 = vmax.f32 %v1296_v10, 0.0  ;;  %v1437_v43 = vrot.slane %v1429_v7, %v3601_v27 }
 0x287   : > { %2720 = vmatpush3.bf16.msra.mxu0 %v1312_v32  ;;  %v1314_v35 = vpack.c.bf16 %v1306_v54, %v1305_v53  ;;  %v1497_v18 = vpop.permute.xlu0 %1496 }
 0x288   : > { %v1313_v58 = vpack.c.bf16 %v1304_v55, %v1303_v24  ;;  %2277 = vperm.xlu1 %2995, %v2263_v63   ;;  %v3627_v55 = vsub.s32 6, %v3259_v29  ;;  %v1505_v59 = vrot.slane %v1497_v18, %v3601_v27 }
 0x289   : > { %v1463_v8 = vpop.permute.xlu1 %1462 }
 0x28a   : > { %2721 = vmatprep.subr.bf16.mxu0 %v1313_v58  ;;  %v1471_v53 = vrot.slane %v1463_v8, %v3601_v27 }
 0x28b   : > { %2722 = vmatpush3.bf16.msra.mxu0 %v1313_v58  ;;  %v1531_v54 = vpop.permute.xlu0 %1530 }
 0x28c   : > { %2723 = vmatprep.subr.bf16.mxu0 %v1314_v35  ;;  %2287 = vperm.xlu1 %2995, %v2265_v0  }
 0x28d   : > { %v1480_v9 = vpop.permute.xlu1 %1479 }
 0x28f   : > { %2724 = vmatpush3.bf16.msra.mxu0 %v1314_v35  ;;  %v1582_v8 = vpop.permute.xlu0 %1581 }
 0x290   : > { %2297 = vperm.xlu1 %2995, %v2267_v1  }
 0x291   : > { %v1327_v11 = vpop.permute.xlu1 %1326 }
 0x292   : > { %2726 = vmatmul.mubr.msk.bf16.vlgmr.msra.gmra.mrb[8].mxu0 %vm1157_vm1, %v3006_v3  ;;  %v1488_v3 = vrot.slane %v1480_v9, %v3601_v27  ;;  %v1539_v9 = vrot.slane %v1531_v54, %v3601_v27 }
 0x293   : > { %2733 = vmatprep.mubr.msk.bf16.mxu0 %vm879_vm0, %v3007_v36  ;;  %v1633_v18 = vpop.permute.xlu0 %1632 }
 0x294   : > { %2307 = vperm.xlu1 %2995, %v2269_v4   ;;  %v1641_v54 = vrot.slane %v1633_v18, %v3601_v27 }
 0x295   : > { %v3572_v12 = vpop.permute.xlu1 %1513 }
 0x296   : > { %v1522_v7 = vrot.slane %v3572_v12, %v3601_v27 }
 0x299   : > { %v3574_v13 = vpop.permute.xlu1 %1547 }
 0x29a   : > { %v1556_v23 = vrot.slane %v3574_v13, %v3601_v27 }
 0x29d   : > { %v3576_v20 = vpop.permute.xlu1 %1564 }
 0x2a1   : > { %v3578_v14 = vpop.permute.xlu1 %1598 }
 0x2a5   : > { %v3580_v15 = vpop.permute.xlu1 %1615 }
 0x2a9   : > { %v3582_v57 = vpop.permute.xlu1 %1331 }
 0x2ad   : > { %v3588_v37 = vpop.permute.xlu1 %1649 }
 0x2b1   : > { %v3590_v47 = vpop.permute.xlu1 %1683 }
 0x2b5   : > { %v3592_v16 = vpop.permute.xlu1 %1700 }
 0x2b9   : > { %v3594_v6 = vpop.permute.xlu1 %1734 }
 0x2bd   : > { %v3596_v42 = vpop.permute.xlu1 %1751 }
 0x2c1   : > { %v3605_v32 = vpop.permute.xlu1 %1336 }
 0x2c5   : > { %v3624_v24 = vpop.permute.xlu1 %1785 }
 0x365   : > { %v3598_v25 = vpop.f32.mrb[8].mxu0 }
 0x366   : > { %v1389_v26 = vpop.f32.mrb[9].mxu0 }
 0x367   : > { %v1390_v28 = vadd.f32 %v1389_v26, %v1322_v5  ;;  %v3603_v2 = vpop.f32.mrb[10].mxu0 }
 0x368   : > { %v1392_v30 = vpop.f32.mrb[11].mxu0 }
 0x369   : > { %v1404_v34 = vmax.f32 %v1390_v28, 0.0  ;;  %v1393_v56 = vadd.f32 %v1392_v30, %v1327_v11  ;;  %v3639_v11 = vpop.permute.xlu1 %1819  ;;  %v1573_v30 = vrot.slane %v3576_v20, %v3601_v27 }
 0x36b   : > { %v1425_v40 = vrot.slane %v1404_v34, %v3269_v31  ;;  %v1441_v44 = vrot.slane %v1404_v34, %v3272_v33  ;;  %v1458_v46 = vrot.slane %v1404_v34, %v3282_v41  ;;  %v1475_v10 = vrot.slane %v1404_v34, %v3608_v50 }
 0x36c   : > { %v1492_v38 = vrot.slane %v1404_v34, %v3617_v49  ;;  %v1509_v63 = vrot.slane %v1404_v34, %v3620_v48  ;;  %v1405_v0 = vmax.f32 %v1393_v56, 0.0  ;;  %v1526_v5 = vrot.slane %v1404_v34, %v3627_v55  ;;  %v1667_v56 = vpop.permute.xlu0 %1666 }
 0x36d   : > { %v1426_v51 = vmul.f32 %v1425_v40, %v1421_v39  ;;  %v1442_v52 = vmul.f32 %v1441_v44, %v1437_v43  ;;  %v1459_v58 = vmul.f32 %v1458_v46, %v1454_v45  ;;  %v1476_v62 = vmul.f32 %v1475_v10, %v1471_v53  ;;  %v3649_v39 = vpop.permute.xlu1 %1836 }
 0x36e   : > { %v1493_v4 = vmul.f32 %v1492_v38, %v1488_v3  ;;  %v1510_v29 = vmul.f32 %v1509_v63, %v1505_v59  ;;  %v1543_v17 = vrot.slane %v1404_v34, %v3633_v60  ;;  %v1560_v19 = vrot.slane %v1405_v0, %v3269_v31 }
 0x36f   : > { %v1443_v35 = vadd.f32 %v1442_v52, %v1426_v51  ;;  %v1527_v22 = vmul.f32 %v1526_v5, %v1522_v7  ;;  %v1577_v26 = vrot.slane %v1405_v0, %v3272_v33  ;;  %v1590_v40 = vrot.slane %v1582_v8, %v3601_v27 }
 0x370   : > { %v1544_v12 = vmul.f32 %v1543_v17, %v1539_v9  ;;  %v1594_v34 = vrot.slane %v1405_v0, %v3282_v41  ;;  %v1561_v43 = vmul.f32 %v1560_v19, %v1556_v23  ;;  %v1611_v13 = vrot.slane %v1405_v0, %v3608_v50  ;;  %v1718_v7 = vpop.permute.xlu0 %1717 }
 0x371   : > { %v1460_v61 = vadd.f32 %v1459_v58, %v1443_v35  ;;  %v1578_v46 = vmul.f32 %v1577_v26, %v1573_v30  ;;  %v1607_v51 = vrot.slane %v3578_v14, %v3601_v27  ;;  %v1398_v52 = vadd.f32 %v3598_v25, %v3582_v57  ;;  %v3660_v35 = vpop.permute.xlu1 %1870 }
 0x372   : > { %v1595_v10 = vmul.f32 %v1594_v34, %v1590_v40  ;;  %v1628_v53 = vrot.slane %v1405_v0, %v3617_v49  ;;  %v1624_v58 = vrot.slane %v3580_v15, %v3601_v27  ;;  %v1645_v59 = vrot.slane %v1405_v0, %v3620_v48 }
 0x373   : > { %v1477_v1 = vadd.f32 %v1476_v62, %v1460_v61  ;;  %v1612_v3 = vmul.f32 %v1611_v13, %v1607_v51  ;;  %v1406_v14 = vmax.f32 %v1398_v52, 0.0  ;;  %v1662_v57 = vrot.slane %v1405_v0, %v3627_v55 }
 0x374   : > { %v1629_v62 = vmul.f32 %v1628_v53, %v1624_v58  ;;  %v1675_v25 = vrot.slane %v1667_v56, %v3601_v27  ;;  %v1658_v63 = vrot.slane %v3588_v37, %v3601_v27  ;;  %v1679_v5 = vrot.slane %v1405_v0, %v3633_v60 }
 0x375   : > { %v1494_v36 = vadd.f32 %v1493_v4, %v1477_v1  ;;  %v1646_v4 = vmul.f32 %v1645_v59, %v1641_v54  ;;  %v3670_v15 = vpop.permute.xlu1 %1887  ;;  %v1696_v8 = vrot.slane %v1406_v14, %v3269_v31  ;;  %v1709_v17 = vrot.slane %v3592_v16, %v3601_v27 }
 0x376   : > { %v1713_v37 = vrot.slane %v1406_v14, %v3272_v33  ;;  %v1730_v26 = vrot.slane %v1406_v14, %v3282_v41  ;;  %v1743_v30 = vrot.slane %v3594_v6, %v3601_v27  ;;  %v1747_v16 = vrot.slane %v1406_v14, %v3608_v50 }
 0x377   : > { %v1511_v21 = vadd.f32 %v1510_v29, %v1494_v36  ;;  %v1663_v36 = vmul.f32 %v1662_v57, %v1658_v63  ;;  %v1692_v29 = vrot.slane %v3590_v47, %v3601_v27  ;;  %v1760_v40 = vrot.slane %v3596_v42, %v3601_v27 }
 0x378   : > { %v1714_v18 = vmul.f32 %v1713_v37, %v1709_v17  ;;  %v1401_v34 = vadd.f32 %v3603_v2, %v3605_v32  ;;  %v1748_v51 = vmul.f32 %v1747_v16, %v1743_v30  ;;  %v1781_v6 = vrot.slane %v1406_v14, %v3620_v48 }
 0x379   : > { %v1528_v28 = vadd.f32 %v1527_v22, %v1511_v21  ;;  %v1680_v21 = vmul.f32 %v1679_v5, %v1675_v25  ;;  %v1726_v22 = vrot.slane %v1718_v7, %v3601_v27  ;;  %v1697_v23 = vmul.f32 %v1696_v8, %v1692_v29 }
 0x37a   : > { %v1794_v52 = vrot.slane %v3624_v24, %v3601_v27  ;;  %v1407_v53 = vmax.f32 %v1401_v34, 0.0  ;;  %v1798_v2 = vrot.slane %v1406_v14, %v3627_v55  ;;  %v1828_v59 = vrot.slane %v3639_v11, %v3601_v27 }
 0x37b   : > { %v1545_v44 = vadd.f32 %v1544_v12, %v1528_v28  ;;  %v1769_v28 = vpop.permute.xlu0 %1768  ;;  %v3680_v12 = vpop.permute.xlu1 %1921  ;;  %v1845_v25 = vrot.slane %v3649_v39, %v3601_v27  ;;  %v1879_v11 = vrot.slane %v3660_v35, %v3601_v27 }
 0x37c   : > { %v1799_v24 = vmul.f32 %v1798_v2, %v1794_v52  ;;  %v1866_v8 = vrot.slane %v1407_v53, %v3282_v41  ;;  %v1883_v17 = vrot.slane %v1407_v53, %v3608_v50  ;;  %v1930_v35 = vrot.slane %v3680_v12, %v3601_v27 }
 0x37d   : > { %v1562_v45 = vadd.f32 %v1561_v43, %v1545_v44  ;;  %v1731_v43 = vmul.f32 %v1730_v26, %v1726_v22  ;;  %v1900_v22 = vrot.slane %v1407_v53, %v3617_v49 }
 0x37f   : > { %v1579_v20 = vadd.f32 %v1578_v46, %v1562_v45  ;;  %v1764_v45 = vrot.slane %v1406_v14, %v3617_v49  ;;  %v1777_v46 = vrot.slane %v1769_v28, %v3601_v27  ;;  %v1917_v28 = vrot.slane %v1407_v53, %v3620_v48 }
 0x381   : > { %v1596_v38 = vadd.f32 %v1595_v10, %v1579_v20  ;;  %v1803_v20 = vpop.permute.xlu0 %1802  ;;  %v1939_v10 = vpop.permute.xlu1 %1938  ;;  %v1765_v54 = vmul.f32 %v1764_v45, %v1760_v40  ;;  %v1782_v58 = vmul.f32 %v1781_v6, %v1777_v46  ;;  %v1951_v40 = vrot.slane %v1407_v53, %v3633_v60  ;;  %v3015_v6 = vld [vmem:[%s3266_s2] sm:$0x7] }
 0x382   : > { %v1811_v32 = vrot.slane %v1803_v20, %v3601_v27  ;;  %v1947_v49 = vrot.slane %v1939_v10, %v3601_v27 }
 0x383   : > { %v1613_v61 = vadd.f32 %v1612_v3, %v1596_v38  ;;  %v1815_v38 = vrot.slane %v1406_v14, %v3633_v60 }
 0x384   : > { %v1952_v45 = vmul.f32 %v1951_v40, %v1947_v49  ;;  %v3009_v49 = vld [vmem:[%s3833_s14 + $0x10] sm:$0xff]   ;;  %v3010_v40 = vld [vmem:[%s3833_s14 + $0x18] sm:$0xff]  }
 0x385   : > { %v1630_v1 = vadd.f32 %v1629_v62, %v1613_v61  ;;  %v3697_v3 = vpop.permute.xlu1 %2962  ;;  %v1832_v62 = vrot.slane %v1407_v53, %v3269_v31  ;;  %v1854_v57 = vpop.permute.xlu0 %1853 }
 0x386   : > { %v1862_v5 = vrot.slane %v1854_v57, %v3601_v27 }
 0x387   : > { %v1647_v9 = vadd.f32 %v1646_v4, %v1630_v1  ;;  %v1816_v1 = vmul.f32 %v1815_v38, %v1811_v32  ;;  %v1849_v4 = vrot.slane %v1407_v53, %v3272_v33  ;;  %v1833_v7 = vmul.f32 %v1832_v62, %v1828_v59 }
 0x388   : > { %v1867_v37 = vmul.f32 %v1866_v8, %v1862_v5 }
 0x389   : > { %v1664_v19 = vadd.f32 %v1663_v36, %v1647_v9  ;;  %v3707_v9 = vpop.permute.xlu1 %2968  ;;  %v1850_v29 = vmul.f32 %v1849_v4, %v1845_v25  ;;  %v1905_v39 = vpop.permute.xlu0 %1904 }
 0x38a   : > { %v1913_v26 = vrot.slane %v1905_v39, %v3601_v27  ;;  %v2970_v60 = vunpack.i.l.bf16 %v3707_v9 }
 0x38b   : > { %v1681_v0 = vadd.f32 %v1680_v21, %v1664_v19  ;;  %v1896_v19 = vrot.slane %v3670_v15, %v3601_v27  ;;  %v2964_v27 = vunpack.i.l.bf16 %v3697_v3 }
 0x38c   : > { %v1918_v16 = vmul.f32 %v1917_v28, %v1913_v26 }
 0x38d   : > { %v1698_v47 = vadd.f32 %v1697_v23, %v1681_v0  ;;  %v1884_v23 = vmul.f32 %v1883_v17, %v1879_v11  ;;  %v2981_v30 = vpop.permute.xlu1 %2980  ;;  %v1901_v50 = vmul.f32 %v1900_v22, %v1896_v19  ;;  %v1958_v34 = vpop.permute.xlu0 %1957 }
 0x38e   : > { %v2982_v38 = vunpack.i.l.bf16 %v2981_v30 }
 0x38f   : > { %v1715_v44 = vadd.f32 %v1714_v18, %v1698_v47  ;;  %v1934_v18 = vrot.slane %v1407_v53, %v3627_v55 }
 0x391   : > { %v1732_v13 = vadd.f32 %v1731_v43, %v1715_v44  ;;  %v1935_v43 = vmul.f32 %v1934_v18, %v1930_v35  ;;  %v2987_v48 = vpop.permute.xlu1 %2986  ;;  %v2975_v12 = vpop.permute.xlu0 %2974 }
 0x392   : > { %v2988_v20 = vunpack.i.l.bf16 %v2987_v48  ;;  %v2976_v10 = vunpack.i.l.bf16 %v2975_v12  ;;  %v2989_v53 = vunpack.i.h.bf16 %v2987_v48  ;;  %v2977_v25 = vunpack.i.h.bf16 %v2975_v12 }
 0x393   : > { %v1749_v42 = vadd.f32 %v1748_v51, %v1732_v13 }
 0x395   : > { %v1766_v56 = vadd.f32 %v1765_v54, %v1749_v42  ;;  %v2062_v55 = vpop.permute.xlu1 %2061  ;;  %v2992_v32 = vpop.permute.xlu0 %2991 }
 0x396   : > { %v2993_v59 = vunpack.i.l.bf16 %v2992_v32  ;;  %v2994_v57 = vunpack.i.h.bf16 %v2992_v32 }
 0x397   : > { %v1783_v61 = vadd.f32 %v1782_v58, %v1766_v56  ;;  %v2965_v56 = vunpack.i.h.bf16 %v3697_v3  ;;  %v2971_v58 = vunpack.i.h.bf16 %v3707_v9 }
 0x399   : > { %v1800_v63 = vadd.f32 %v1799_v24, %v1783_v61  ;;  %v2983_v61 = vunpack.i.h.bf16 %v2981_v30  ;;  %v2067_v26 = vpop.permute.xlu0 %2066 }
 0x39b   : > { %v1817_v14 = vadd.f32 %v1816_v1, %v1800_v63  ;;  %v2072_v1 = vpop.permute.xlu1 %2071 }
 0x39d   : > { %v1834_v36 = vadd.f32 %v1833_v7, %v1817_v14 }
 0x39f   : > { %v1851_v21 = vadd.f32 %v1850_v29, %v1834_v36 }
 0x3a1   : > { %v1868_v0 = vadd.f32 %v1867_v37, %v1851_v21  ;;  %v2077_v37 = vpop.permute.xlu1 %2076 }
 0x3a3   : > { %v1885_v47 = vadd.f32 %v1884_v23, %v1868_v0 }
 0x3a5   : > { %v1902_v15 = vadd.f32 %v1901_v50, %v1885_v47 }
 0x3a7   : > { %v1919_v44 = vadd.f32 %v1918_v16, %v1902_v15  ;;  %v3008_v16 = vld [vmem:[%s3833_s14 + $0x8] sm:$0xff]  }
 0x3a9   : > { %v1936_v46 = vadd.f32 %v1935_v43, %v1919_v44  ;;  %v2108_v44 = vpop.permute.xlu0 %2107  ;;  %v2113_v43 = vpop.permute.xlu1 %2112 }
 0x3ab   : > { %v1953_v13 = vadd.f32 %v1952_v45, %v1936_v46 }
 0x3ad   : > { %v1960_v51 = vadd.f32 %v1958_v34, %v1953_v13  ;;  %v3011_v34 = vld [vmem:[%s3835_s16] sm:$0xff]   ;;  %v2118_v48 = vpop.permute.xlu0 %2117  ;;  %v2123_v45 = vpop.permute.xlu1 %2122 }
 0x3ae   : > { %2749 = vmatprep.mubr.msk.bf16.mxu1 %vm1157_vm1, %v3011_v34 }
 0x3af   : > { %v1961_v52 = vadd.f32 %v3015_v6, %v1960_v51 }
 0x3b1   : > { %1962 = vst [vmem:[%s656_s28] sm:$0x7] %v1961_v52  ;;  %v1994_v42 = vrot.slane %v1961_v52, %v3269_v31  ;;  %v2018_v54 = vrot.slane %v1961_v52, %v3272_v33  ;;  %v2046_v2 = vrot.slane %v1961_v52, %v3282_v41  ;;  %v2128_v51 = vpop.permute.xlu0 %2127 }
 0x3b3   : > { %v1995_v24 = vmul.f32 %v2964_v27, %v1994_v42  ;;  %v2019_v62 = vmul.f32 %v2970_v60, %v2018_v54  ;;  %v2047_v63 = vmul.f32 %v2976_v10, %v2046_v2  ;;  %v1997_v4 = vmul.f32 %v2982_v38, %v1994_v42  ;;  %v2133_v60 = vpop.permute.xlu1 %2132 }
 0x3b4   : > { %v2021_v31 = vmul.f32 %v2988_v20, %v2018_v54  ;;  %v1998_v33 = vmul.f32 %v2983_v61, %v1994_v42  ;;  %v2022_v14 = vmul.f32 %v2989_v53, %v2018_v54  ;;  %v1996_v41 = vmul.f32 %v2965_v56, %v1994_v42 }
 0x3b5   : > { %v2023_v5 = vadd.f32 %v2019_v62, %v1995_v24  ;;  %v2049_v8 = vmul.f32 %v2993_v59, %v2046_v2  ;;  %v2020_v3 = vmul.f32 %v2971_v58, %v2018_v54  ;;  %v2050_v9 = vmul.f32 %v2994_v57, %v2046_v2  ;;  %v2138_v32 = vpop.permute.xlu0 %2137 }
 0x3b6   : > { %v2025_v7 = vadd.f32 %v2021_v31, %v1997_v4  ;;  %v2026_v36 = vadd.f32 %v2022_v14, %v1998_v33  ;;  %v2048_v29 = vmul.f32 %v2977_v25, %v2046_v2 }
 0x3b7   : > { %v2051_v11 = vadd.f32 %v2047_v63, %v2023_v5  ;;  %v2024_v39 = vadd.f32 %v2020_v3, %v1996_v41  ;;  %v2143_v61 = vpop.permute.xlu1 %2142  ;;  %v3012_v41 = vld [vmem:[%s3835_s16 + $0x8] sm:$0xff]   ;;  %v3073_v3 = vmov -inf  }
 0x3b8   : > { %v2053_v17 = vadd.f32 %v2049_v8, %v2025_v7  ;;  %v2054_v19 = vadd.f32 %v2050_v9, %v2026_v36  ;;  %v3013_v7 = vld [vmem:[%s3835_s16 + $0x10] sm:$0xff]   ;;  %v3014_v8 = vld [vmem:[%s3835_s16 + $0x18] sm:$0xff]   ;;  %670 = vst.msk [vmem:[%s3768_s24 + $0x10] sm:$0xff] %vm667_vm2, %v3073_v3  ;;  %668 = vst.msk [vmem:[%s3768_s24] sm:$0xff] %vm667_vm2, %v3073_v3 }
 0x3b9   : > { %v2079_v21 = vadd.f32 %v2062_v55, %v2051_v11  ;;  %v2052_v0 = vadd.f32 %v2048_v29, %v2024_v39  ;;  %669 = vst.msk [vmem:[%s3768_s24 + $0x8] sm:$0xff] %vm667_vm2, %v3073_v3  ;;  %671 = vst.msk [vmem:[%s3768_s24 + $0x18] sm:$0xff] %vm667_vm2, %v3073_v3  ;;  %v2273_v11 = vpop.permute.xlu0 %2272 }
 0x3ba   : > { %v2081_v22 = vadd.f32 %v2072_v1, %v2053_v17  ;;  %v2082_v23 = vadd.f32 %v2077_v37, %v2054_v19  ;;  %672 = vst.msk [vmem:[%s3768_s24 + $0x20] sm:$0xff] %vm667_vm2, %v3073_v3  ;;  %673 = vst.msk [vmem:[%s3768_s24 + $0x28] sm:$0xff] %vm667_vm2, %v3073_v3 }
 0x3bb   : > { %v2080_v28 = vadd.f32 %v2067_v26, %v2052_v0  ;;  %v2083_v30 = vmax.f32 %v2079_v21, 0.0  ;;  %674 = vst.msk [vmem:[%s3768_s24 + $0x30] sm:$0xff] %vm667_vm2, %v3073_v3  ;;  %675 = vst.msk [vmem:[%s3768_s24 + $0x38] sm:$0xff] %vm667_vm2, %v3073_v3  ;;  %v2278_v9 = vpop.permute.xlu1 %2277 }
 0x3bc   : > { %v2085_v35 = vmax.f32 %v2081_v22, 0.0  ;;  %v2086_v47 = vmax.f32 %v2082_v23, 0.0 }
 0x3bd   : > { %v2084_v50 = vmax.f32 %v2080_v28, 0.0  ;;  %v2283_v36 = vpop.permute.xlu0 %2282 }
 0x3be   : > { %v2096_v15 = vpack.c.bf16 %v2086_v47, %v2085_v35 }
 0x3bf   : > { %v2095_v18 = vpack.c.bf16 %v2084_v50, %v2083_v30  ;;  %v2288_v37 = vpop.permute.xlu1 %2287 }
 0x3c1   : > { %2729 = vmatprep.subr.bf16.mxu0 %v2095_v18  ;;  %v2293_v23 = vpop.permute.xlu0 %2292 }
 0x3c2   : > { %2730 = vmatpush3.bf16.msra.mxu0 %v2095_v18 }
 0x3c3   : > { %2731 = vmatprep.subr.bf16.mxu0 %v2096_v15  ;;  %v2298_v35 = vpop.permute.xlu1 %2297 }
 0x3c6   : > { %2732 = vmatpush3.bf16.msra.mxu0 %v2096_v15 }
 0x3c9   : > { %2734 = vmatmul.mubr.msk.bf16.vlgmr.msra.gmra.mrb[12].mxu0 %vm879_vm0, %v3008_v16  ;;  %v2303_v16 = vpop.permute.xlu0 %2302 }
 0x3ca   : > { %2737 = vmatprep.mubr.msk.bf16.mxu0 %vm879_vm0, %v3009_v49 }
 0x3d1   : > { %2738 = vmatmul.mubr.msk.bf16.gmra.mrb[16].mxu0 %vm879_vm0, %v3010_v40  ;;  %v2308_v40 = vpop.permute.xlu1 %2307 }
 0x49c   : > { %v2735_v46 = vpop.f32.mrb[12].mxu0 }
 0x49d   : > { %v2220_v13 = vadd.f32 %v2735_v46, %v2118_v48  ;;  %v2211_v12 = vpop.f32.mrb[13].mxu0  ;;  %v2407_v46 = vld [vmem:[%s3768_s24] sm:$0xff] }
 0x49e   : > { %v2212_v55 = vadd.f32 %v2211_v12, %v2108_v44  ;;  %v2736_v6 = vpop.f32.mrb[14].mxu0  ;;  %v2409_v44 = vld [vmem:[%s3768_s24 + $0x10] sm:$0xff] }
 0x49f   : > { %v2223_v52 = vadd.f32 %v2736_v6, %v2123_v45  ;;  %v2214_v27 = vpop.f32.mrb[15].mxu0  ;;  %v2244_v10 = vmax.f32 %v2220_v13, 0.0  ;;  %v2408_v45 = vld [vmem:[%s3768_s24 + $0x8] sm:$0xff]  ;;  %v2410_v6 = vld [vmem:[%s3768_s24 + $0x18] sm:$0xff] }
 0x4a0   : > { %v2215_v20 = vadd.f32 %v2214_v27, %v2113_v43  ;;  %v2242_v42 = vmax.f32 %v2212_v55, 0.0 }
 0x4a1   : > { %v2245_v53 = vmax.f32 %v2223_v52, 0.0  ;;  %v2411_v52 = vld [vmem:[%s3768_s24 + $0x20] sm:$0xff] }
 0x4a2   : > { %v2243_v54 = vmax.f32 %v2215_v20, 0.0 }
 0x4a3   : > { %v2259_v2 = vpack.c.bf16 %v2245_v53, %v2244_v10  ;;  %v2412_v53 = vld [vmem:[%s3768_s24 + $0x28] sm:$0xff] }
 0x4a4   : > { %v2258_v56 = vpack.c.bf16 %v2243_v54, %v2242_v42  ;;  %v2739_v58 = vpop.f32.mrb[16].mxu0  ;;  %v2413_v42 = vld [vmem:[%s3768_s24 + $0x30] sm:$0xff] }
 0x4a5   : > { %v2236_v38 = vadd.f32 %v2739_v58, %v2138_v32  ;;  %v2227_v59 = vpop.f32.mrb[17].mxu0  ;;  %v2414_v58 = vld [vmem:[%s3768_s24 + $0x38] sm:$0xff] }
 0x4a6   : > { %v2228_v24 = vadd.f32 %v2227_v59, %v2128_v51  ;;  %v2740_v62 = vpop.f32.mrb[18].mxu0  ;;  %2741 = vmatprep.subr.bf16.mxu1 %v2258_v56 }
 0x4a7   : > { %v2239_v57 = vadd.f32 %v2740_v62, %v2143_v61  ;;  %v2230_v25 = vpop.f32.mrb[19].mxu0  ;;  %2742 = vmatpush3.bf16.msra.mxu1 %v2258_v56  ;;  %v2248_v1 = vmax.f32 %v2236_v38, 0.0 }
 0x4a8   : > { %v2231_v63 = vadd.f32 %v2230_v25, %v2133_v60  ;;  %2743 = vmatprep.subr.bf16.mxu1 %v2259_v2  ;;  %v2246_v31 = vmax.f32 %v2228_v24, 0.0 }
 0x4a9   : > { %v2249_v4 = vmax.f32 %v2239_v57, 0.0 }
 0x4aa   : > { %v2247_v5 = vmax.f32 %v2231_v63, 0.0 }
 0x4ab   : > { %v2261_v33 = vpack.c.bf16 %v2249_v4, %v2248_v1  ;;  %2744 = vmatpush3.bf16.msra.mxu1 %v2259_v2 }
 0x4ac   : > { %v2260_v14 = vpack.c.bf16 %v2247_v5, %v2246_v31 }
 0x4ae   : > { %2745 = vmatprep.subr.bf16.mxu1 %v2260_v14 }
 0x4af   : > { %2746 = vmatpush3.bf16.msra.mxu1 %v2260_v14 }
 0x4b0   : > { %2747 = vmatprep.subr.bf16.mxu1 %v2261_v33 }
 0x4b3   : > { %2748 = vmatpush3.bf16.msra.mxu1 %v2261_v33 }
 0x4b6   : > { %2750 = vmatmul.mubr.msk.bf16.vlgmr.msra.gmra.mrb[8].mxu1 %vm1157_vm1, %v3012_v41 }
 0x4b7   : > { %2753 = vmatprep.mubr.msk.bf16.mxu1 %vm1157_vm1, %v3013_v7 }
 0x4be   : > { %2754 = vmatmul.mubr.msk.bf16.gmra.mrb[12].mxu1 %vm1157_vm1, %v3014_v8 }
 0x589   : > { %v2751_v29 = vpop.f32.mrb[8].mxu1 }
 0x58a   : > { %v2385_v17 = vadd.f32 %v2751_v29, %v2283_v36  ;;  %v2376_v39 = vpop.f32.mrb[9].mxu1 }
 0x58b   : > { %v2752_v19 = vpop.f32.mrb[10].mxu1  ;;  %v2377_v0 = vadd.f32 %v2376_v39, %v2273_v11 }
 0x58c   : > { %2419 = vmax.xlane.f32.xlu0 %v2385_v17  ;;  %v2379_v21 = vpop.f32.mrb[11].mxu1  ;;  %v2388_v28 = vadd.f32 %v2752_v19, %v2288_v37 }
 0x58d   : > { %v2380_v22 = vadd.f32 %v2379_v21, %v2278_v9 }
 0x58f   : > { %2417 = vmax.xlane.f32.xlu1 %v2380_v22 }
 0x590   : > { %2415 = vmax.xlane.f32.xlu0 %v2377_v0 }
 0x591   : > { %v2755_v26 = vpop.f32.mrb[12].mxu1 }
 0x592   : > { %v2392_v30 = vpop.f32.mrb[13].mxu1  ;;  %v2401_v49 = vadd.f32 %v2755_v26, %v2303_v16 }
 0x593   : > { %v2393_v47 = vadd.f32 %v2392_v30, %v2293_v23  ;;  %v2756_v50 = vpop.f32.mrb[14].mxu1 }
 0x594   : > { %v2395_v18 = vpop.f32.mrb[15].mxu1  ;;  %2421 = vmax.xlane.f32.xlu0 %v2388_v28  ;;  %v2404_v34 = vadd.f32 %v2756_v50, %v2308_v40 }
 0x595   : > { %v2396_v15 = vadd.f32 %v2395_v18, %v2298_v35  ;;  %2423 = vmax.xlane.f32.xlu1 %v2393_v47 }
 0x598   : > { %2425 = vmax.xlane.f32.xlu0 %v2396_v15 }
 0x599   : > { %2427 = vmax.xlane.f32.xlu1 %v2401_v49 }
 0x59c   : > { %2429 = vmax.xlane.f32.xlu0 %v2404_v34 }
 0x619   : > { %v2420_v43 = vpop.xlane.xlu0 %2419 }
 0x61a   : > { %v2433_v48 = vmax.f32 %v2409_v44, %v2420_v43 }
 0x61c   : > { %2442 = vst.msk [vmem:[%s3768_s24 + $0x10] sm:$0xff] %vm667_vm2, %v2433_v48  ;;  %v2418_v13 = vpop.xlane.xlu1 %2417 }
 0x61d   : > { %v2432_v12 = vmax.f32 %v2408_v45, %v2418_v13  ;;  %v2416_v51 = vpop.xlane.xlu0 %2415 }
 0x61e   : > { %v2431_v55 = vmax.f32 %v2407_v46, %v2416_v51 }
 0x61f   : > { %2441 = vst.msk [vmem:[%s3768_s24 + $0x8] sm:$0xff] %vm667_vm2, %v2432_v12 }
 0x620   : > { %2440 = vst.msk [vmem:[%s3768_s24] sm:$0xff] %vm667_vm2, %v2431_v55 }
 0x621   : > { %v2422_v27 = vpop.xlane.xlu0 %2421 }
 0x622   : > { %v2434_v60 = vmax.f32 %v2410_v6, %v2422_v27  ;;  %v2424_v20 = vpop.xlane.xlu1 %2423 }
 0x623   : > { %v2435_v10 = vmax.f32 %v2411_v52, %v2424_v20 }
 0x624   : > { %2443 = vst.msk [vmem:[%s3768_s24 + $0x18] sm:$0xff] %vm667_vm2, %v2434_v60 }
 0x625   : > { %2444 = vst.msk [vmem:[%s3768_s24 + $0x20] sm:$0xff] %vm667_vm2, %v2435_v10  ;;  %v2426_v54 = vpop.xlane.xlu0 %2425 }
 0x626   : > { %v2436_v2 = vmax.f32 %v2412_v53, %v2426_v54  ;;  %v2428_v32 = vpop.xlane.xlu1 %2427 }
 0x627   : > { %v2437_v56 = vmax.f32 %v2413_v42, %v2428_v32 }
 0x628   : > { %2445 = vst.msk [vmem:[%s3768_s24 + $0x28] sm:$0xff] %vm667_vm2, %v2436_v2 }
 0x629   : > { %2446 = vst.msk [vmem:[%s3768_s24 + $0x30] sm:$0xff] %vm667_vm2, %v2437_v56  ;;  %v2430_v38 = vpop.xlane.xlu0 %2429 }
 0x62a   : > { %v2438_v59 = vmax.f32 %v2414_v58, %v2430_v38 }
 0x62c   : > { %2447 = vst.msk [vmem:[%s3768_s24 + $0x38] sm:$0xff] %vm667_vm2, %v2438_v59 }
 0x62d PF: > { %s30_s20 = sadd.s32 1, %s3038_s20   ;;  %s3856_s0 = smov %s3034_s30 }
 0x62e   : > { %p27_p5 = scmp.ge.s32.totalorder %s30_s20, 4   ;;  %s3857_s30 = smov %s3859_s21 }
 0x630   :  { %29 = sbr.rel (!%p27_p5) target bundleno = 6 (0x6), region = 141 }

</bundles_post_ra>
